<compile_context>
chip_gen: v7x
topology: tpu7x:2x2x1
jax: 0.10.0
libtpu: 0.0.40
codegen_flags: <defaults>
</compile_context>

<pallas_src>
import functools
import math

import jax
import jax.numpy as jnp
from jax.experimental import pallas as pl
from jax.experimental.pallas import tpu as pltpu

# ----------------------- tiny BERT config (synthetic) -----------------------
VOCAB = 100
MAX_POS = 64
TYPE_VOCAB = 2
HIDDEN = 32
HEADS = 4
HEAD_DIM = HIDDEN // HEADS
INTERMEDIATE = 64
LAYERS = 2
NUM_LABELS = 9
CLS_PAD = 128          # lane-dense classifier output width (>= NUM_LABELS)
LN_EPS = 1e-12         # HF BertConfig default


# ------------------------------ fused kernel --------------------------------
def _bert_kernel(
    mask_ref,            # (B, S)            float32 attention mask (1/0)
    x_ref,               # (B*S, HIDDEN)     embedding sum (pre-LayerNorm)
    emb_ln_g_ref, emb_ln_b_ref,              # (1, HIDDEN)
    qkv_w_ref, qkv_b_ref,                    # (L, HIDDEN, 3*HIDDEN), (L, 1, 3*HIDDEN)
    o_w_ref, o_b_ref,                        # (L, HIDDEN, HIDDEN),  (L, 1, HIDDEN)
    attn_ln_g_ref, attn_ln_b_ref,            # (L, 1, HIDDEN)
    i_w_ref, i_b_ref,                        # (L, HIDDEN, INTER),   (L, 1, INTER)
    f_w_ref, f_b_ref,                        # (L, INTER, HIDDEN),   (L, 1, HIDDEN)
    ffn_ln_g_ref, ffn_ln_b_ref,              # (L, 1, HIDDEN)
    cls_w_ref, cls_b_ref,                    # (HIDDEN, CLS_PAD),    (1, CLS_PAD)
    out_ref,             # (B*S, CLS_PAD)
    ctx_ref,             # scratch (B*S, HIDDEN) — attention context assembly
    *,
    batch, seq,
):
    def layer_norm(v, g, b):
        mean = jnp.mean(v, axis=-1, keepdims=True)
        var = jnp.mean((v - mean) ** 2, axis=-1, keepdims=True)
        inv = jax.lax.rsqrt(var + LN_EPS)
        return (v - mean) * inv * g + b

    def gelu(v):
        # TODO(synk): HF BERT default is erf-GELU; tanh approximation used here
        # (numerically very close) to guarantee TPU Pallas lowering.
        c = math.sqrt(2.0 / math.pi)
        return 0.5 * v * (1.0 + jnp.tanh(c * (v + 0.044715 * v * v * v)))

    scale = 1.0 / math.sqrt(HEAD_DIM)

    # Additive attention mask, broadcast in-kernel (hoisted out of all loops).
    neg = (1.0 - mask_ref[...]) * -1e9                       # (B, S)

    # Embedding LayerNorm.
    x = layer_norm(x_ref[...], emb_ln_g_ref[...], emb_ln_b_ref[...])

    for l in range(LAYERS):
        # ---- fused QKV projection: one (H, 3H) matmul --------------------
        qkv = (jnp.dot(x, qkv_w_ref[l], preferred_element_type=jnp.float32)
               + qkv_b_ref[l])                               # (B*S, 3*HIDDEN)

        # ---- per-(batch, head) scaled dot-product attention --------------
        for b in range(batch):
            r0, r1 = b * seq, (b + 1) * seq
            neg_b = neg[b:b + 1, :]                          # (1, S) -> bcast over queries
            for h in range(HEADS):
                cq = h * HEAD_DIM
                ck = HIDDEN + h * HEAD_DIM
                cv = 2 * HIDDEN + h * HEAD_DIM
                q_bh = qkv[r0:r1, cq:cq + HEAD_DIM]          # (S, D)
                k_bh = qkv[r0:r1, ck:ck + HEAD_DIM]          # (S, D)
                v_bh = qkv[r0:r1, cv:cv + HEAD_DIM]          # (S, D)

                s = jax.lax.dot_general(
                    q_bh, k_bh, (((1,), (1,)), ((), ())),
                    preferred_element_type=jnp.float32) * scale   # (S, S)
                s = s + neg_b
                s = s - jnp.max(s, axis=-1, keepdims=True)   # stable softmax
                p = jnp.exp(s)
                denom = jnp.sum(p, axis=-1, keepdims=True)
                p = p * pl.reciprocal(denom, approx=True)
                ctx_ref[r0:r1, cq:cq + HEAD_DIM] = jnp.dot(
                    p, v_bh, preferred_element_type=jnp.float32)

        ctx = ctx_ref[...]                                   # (B*S, HIDDEN)

        # ---- output projection + residual + LayerNorm (fused) ------------
        attn_out = (jnp.dot(ctx, o_w_ref[l], preferred_element_type=jnp.float32)
                    + o_b_ref[l])
        x = layer_norm(attn_out + x, attn_ln_g_ref[l], attn_ln_b_ref[l])

        # ---- feed-forward + residual + LayerNorm (fused) ------------------
        hh = (jnp.dot(x, i_w_ref[l], preferred_element_type=jnp.float32)
              + i_b_ref[l])
        hh = gelu(hh)
        ffn_out = (jnp.dot(hh, f_w_ref[l], preferred_element_type=jnp.float32)
                   + f_b_ref[l])
        x = layer_norm(ffn_out + x, ffn_ln_g_ref[l], ffn_ln_b_ref[l])

    # ---- classification head: lane-dense (CLS_PAD = 128) output store ----
    out_ref[...] = (jnp.dot(x, cls_w_ref[...], preferred_element_type=jnp.float32)
                    + cls_b_ref[...])


def _full_spec(shape):
    shape = tuple(int(d) for d in shape)

    def idx():
        return (0,) * len(shape)

    return pl.BlockSpec(shape, idx)


# ------------------------------- model glue ---------------------------------
def init_params(key):
    ks = iter(jax.random.split(key, 32))

    def w(shape):
        return jax.random.normal(next(ks), shape, jnp.float32) * 0.02

    def zeros(shape):
        return jnp.zeros(shape, jnp.float32)

    def ones(shape):
        return jnp.ones(shape, jnp.float32)

    # Per-layer weights stacked along a leading "layer" axis; Q/K/V fused.
    qkv_w = jnp.stack([
        jnp.concatenate([w((HIDDEN, HIDDEN)), w((HIDDEN, HIDDEN)),
                         w((HIDDEN, HIDDEN))], axis=1)
        for _ in range(LAYERS)], axis=0)                     # (L, H, 3H)
    o_w = jnp.stack([w((HIDDEN, HIDDEN)) for _ in range(LAYERS)], axis=0)
    i_w = jnp.stack([w((HIDDEN, INTERMEDIATE)) for _ in range(LAYERS)], axis=0)
    f_w = jnp.stack([w((INTERMEDIATE, HIDDEN)) for _ in range(LAYERS)], axis=0)

    cls_w_small = w((HIDDEN, NUM_LABELS))
    cls_w = jnp.zeros((HIDDEN, CLS_PAD), jnp.float32).at[:, :NUM_LABELS].set(cls_w_small)

    return dict(
        word_emb=w((VOCAB, HIDDEN)),
        pos_emb=w((MAX_POS, HIDDEN)),
        type_emb=w((TYPE_VOCAB, HIDDEN)),
        emb_ln_g=ones((1, HIDDEN)), emb_ln_b=zeros((1, HIDDEN)),
        qkv_w=qkv_w, qkv_b=zeros((LAYERS, 1, 3 * HIDDEN)),
        o_w=o_w, o_b=zeros((LAYERS, 1, HIDDEN)),
        attn_ln_g=ones((LAYERS, 1, HIDDEN)), attn_ln_b=zeros((LAYERS, 1, HIDDEN)),
        i_w=i_w, i_b=zeros((LAYERS, 1, INTERMEDIATE)),
        f_w=f_w, f_b=zeros((LAYERS, 1, HIDDEN)),
        ffn_ln_g=ones((LAYERS, 1, HIDDEN)), ffn_ln_b=zeros((LAYERS, 1, HIDDEN)),
        cls_w=cls_w, cls_b=zeros((1, CLS_PAD)),
    )


def model_forward(params, input_ids, attention_mask):
    """Reproduces Model.forward: BERT(last_hidden_state) -> Linear(num_labels)."""
    B, S = input_ids.shape

    # --- embeddings (gather is XLA glue; everything else is in the kernel) ---
    we = jnp.take(params["word_emb"], input_ids, axis=0)          # (B,S,H)
    pe = params["pos_emb"][:S]                                    # (S,H)
    te = params["type_emb"][0]                                    # (H,)  token_type_ids = 0
    x = (we + pe[None, :, :] + te[None, None, :]).reshape(B * S, HIDDEN)
    x = x.astype(jnp.float32)
    mask_f = attention_mask.astype(jnp.float32)                   # (B,S)

    args = (
        mask_f, x,
        params["emb_ln_g"], params["emb_ln_b"],
        params["qkv_w"], params["qkv_b"],
        params["o_w"], params["o_b"],
        params["attn_ln_g"], params["attn_ln_b"],
        params["i_w"], params["i_b"],
        params["f_w"], params["f_b"],
        params["ffn_ln_g"], params["ffn_ln_b"],
        params["cls_w"], params["cls_b"],
    )
    in_specs = [_full_spec(a.shape) for a in args]

    out_padded = pl.pallas_call(
        functools.partial(_bert_kernel, batch=B, seq=S),
        out_shape=jax.ShapeDtypeStruct((B * S, CLS_PAD), jnp.float32),
        in_specs=in_specs,
        out_specs=_full_spec((B * S, CLS_PAD)),
        scratch_shapes=[pltpu.VMEM((B * S, HIDDEN), jnp.float32)],
    )(*args)

    features = out_padded[:, :NUM_LABELS].reshape(B, S, NUM_LABELS)
    return dict(features=features)


# ---------------------------------- main -------------------------------------
if __name__ == "__main__":
    key = jax.random.PRNGKey(0)
    k_params, k_ids = jax.random.split(key)

    params = init_params(k_params)

    B, S = 2, 8
    input_ids = jax.random.randint(k_ids, (B, S), 0, VOCAB, dtype=jnp.int32)
    attention_mask = jnp.array(
        [[1, 1, 1, 1, 1, 1, 1, 1],
         [1, 1, 1, 1, 1, 0, 0, 0]], dtype=jnp.int32)

    fwd = jax.jit(model_forward)
    out = fwd(params, input_ids, attention_mask)
    features = jax.block_until_ready(out["features"])

    assert features.shape == (B, S, NUM_LABELS)
    assert bool(jnp.all(jnp.isfinite(features)))
    print("KERNEL_OK")
</pallas_src>

<mosaic_0001>
module attributes {stable_mosaic.version = 11 : i64} {
  func.func @_bert_kernel(%arg0: memref<2x8xf32, #tpu.memory_space<vmem>>, %arg1: memref<16x32xf32, #tpu.memory_space<vmem>>, %arg2: memref<1x32xf32, #tpu.memory_space<vmem>>, %arg3: memref<1x32xf32, #tpu.memory_space<vmem>>, %arg4: memref<2x32x96xf32, #tpu.memory_space<vmem>>, %arg5: memref<2x1x96xf32, #tpu.memory_space<vmem>>, %arg6: memref<2x32x32xf32, #tpu.memory_space<vmem>>, %arg7: memref<2x1x32xf32, #tpu.memory_space<vmem>>, %arg8: memref<2x1x32xf32, #tpu.memory_space<vmem>>, %arg9: memref<2x1x32xf32, #tpu.memory_space<vmem>>, %arg10: memref<2x32x64xf32, #tpu.memory_space<vmem>>, %arg11: memref<2x1x64xf32, #tpu.memory_space<vmem>>, %arg12: memref<2x64x32xf32, #tpu.memory_space<vmem>>, %arg13: memref<2x1x32xf32, #tpu.memory_space<vmem>>, %arg14: memref<2x1x32xf32, #tpu.memory_space<vmem>>, %arg15: memref<2x1x32xf32, #tpu.memory_space<vmem>>, %arg16: memref<32x128xf32, #tpu.memory_space<vmem>>, %arg17: memref<1x128xf32, #tpu.memory_space<vmem>>, %arg18: memref<16x128xf32, #tpu.memory_space<vmem>>, %arg19: memref<16x32xf32, #tpu.memory_space<vmem>>) attributes {dimension_semantics = [], scalar_prefetch = 0 : i64, scratch_operands = 1 : i64, tpu.core_type = #tpu.core_type<tc>} {
    %c0 = arith.constant 0 : index
    %c0_0 = arith.constant 0 : index
    %0 = vector.load %arg0[%c0, %c0_0] : memref<2x8xf32, #tpu.memory_space<vmem>>, vector<2x8xf32>
    %cst = arith.constant 1.000000e+00 : f32
    %1 = vector.broadcast %cst : f32 to vector<2x8xf32>
    %2 = arith.subf %1, %0 : vector<2x8xf32>
    %cst_1 = arith.constant -1.000000e+09 : f32
    %3 = vector.broadcast %cst_1 : f32 to vector<2x8xf32>
    %4 = arith.mulf %2, %3 : vector<2x8xf32>
    %c0_2 = arith.constant 0 : index
    %c0_3 = arith.constant 0 : index
    %5 = vector.load %arg1[%c0_2, %c0_3] : memref<16x32xf32, #tpu.memory_space<vmem>>, vector<16x32xf32>
    %c0_4 = arith.constant 0 : index
    %c0_5 = arith.constant 0 : index
    %6 = vector.load %arg2[%c0_4, %c0_5] : memref<1x32xf32, #tpu.memory_space<vmem>>, vector<1x32xf32>
    %c0_6 = arith.constant 0 : index
    %c0_7 = arith.constant 0 : index
    %7 = vector.load %arg3[%c0_6, %c0_7] : memref<1x32xf32, #tpu.memory_space<vmem>>, vector<1x32xf32>
    %cst_8 = arith.constant dense<0.000000e+00> : vector<16xf32>
    %8 = vector.multi_reduction <add>, %5, %cst_8 [1] : vector<16x32xf32> to vector<16xf32>
    %9 = vector.shape_cast %8 : vector<16xf32> to vector<16x1xf32>
    %cst_9 = arith.constant 3.200000e+01 : f32
    %10 = vector.broadcast %cst_9 : f32 to vector<16x1xf32>
    %11 = arith.divf %9, %10 : vector<16x1xf32>
    %12 = vector.broadcast %11 : vector<16x1xf32> to vector<16x32xf32>
    %13 = arith.subf %5, %12 : vector<16x32xf32>
    %14 = arith.mulf %13, %13 : vector<16x32xf32>
    %cst_10 = arith.constant dense<0.000000e+00> : vector<16xf32>
    %15 = vector.multi_reduction <add>, %14, %cst_10 [1] : vector<16x32xf32> to vector<16xf32>
    %16 = vector.shape_cast %15 : vector<16xf32> to vector<16x1xf32>
    %cst_11 = arith.constant 3.200000e+01 : f32
    %17 = vector.broadcast %cst_11 : f32 to vector<16x1xf32>
    %18 = arith.divf %16, %17 : vector<16x1xf32>
    %cst_12 = arith.constant 9.99999996E-13 : f32
    %19 = vector.broadcast %cst_12 : f32 to vector<16x1xf32>
    %20 = arith.addf %18, %19 : vector<16x1xf32>
    %21 = math.rsqrt %20 : vector<16x1xf32>
    %22 = vector.broadcast %11 : vector<16x1xf32> to vector<16x32xf32>
    %23 = arith.subf %5, %22 : vector<16x32xf32>
    %24 = vector.broadcast %21 : vector<16x1xf32> to vector<16x32xf32>
    %25 = arith.mulf %23, %24 : vector<16x32xf32>
    %26 = vector.broadcast %6 : vector<1x32xf32> to vector<16x32xf32>
    %27 = arith.mulf %25, %26 : vector<16x32xf32>
    %28 = vector.broadcast %7 : vector<1x32xf32> to vector<16x32xf32>
    %29 = arith.addf %27, %28 : vector<16x32xf32>
    %c0_13 = arith.constant 0 : index
    %c0_14 = arith.constant 0 : index
    %c0_15 = arith.constant 0 : index
    %30 = vector.load %arg4[%c0_13, %c0_14, %c0_15] : memref<2x32x96xf32, #tpu.memory_space<vmem>>, vector<1x32x96xf32>
    %31 = vector.shape_cast %30 : vector<1x32x96xf32> to vector<32x96xf32>
    %cst_16 = arith.constant dense<0.000000e+00> : vector<16x96xf32>
    %32 = tpu.matmul %29, %31, %cst_16 {dimension_numbers = #tpu.dot_dimension_numbers<[1], [0], [0], [1], [0, 0, 1, 1], [], []>} : vector<16x32xf32>, vector<32x96xf32>, vector<16x96xf32> -> vector<16x96xf32>
    %c0_17 = arith.constant 0 : index
    %c0_18 = arith.constant 0 : index
    %c0_19 = arith.constant 0 : index
    %33 = vector.load %arg5[%c0_17, %c0_18, %c0_19] : memref<2x1x96xf32, #tpu.memory_space<vmem>>, vector<1x1x96xf32>
    %34 = vector.shape_cast %33 : vector<1x1x96xf32> to vector<1x96xf32>
    %35 = vector.broadcast %34 : vector<1x96xf32> to vector<16x96xf32>
    %36 = arith.addf %32, %35 : vector<16x96xf32>
    %37 = vector.extract_strided_slice %4 {offsets = [0, 0], sizes = [1, 8], strides = [1, 1]} : vector<2x8xf32> to vector<1x8xf32>
    %38 = vector.extract_strided_slice %36 {offsets = [0, 0], sizes = [8, 8], strides = [1, 1]} : vector<16x96xf32> to vector<8x8xf32>
    %39 = vector.extract_strided_slice %36 {offsets = [0, 32], sizes = [8, 8], strides = [1, 1]} : vector<16x96xf32> to vector<8x8xf32>
    %40 = vector.extract_strided_slice %36 {offsets = [0, 64], sizes = [8, 8], strides = [1, 1]} : vector<16x96xf32> to vector<8x8xf32>
    %cst_20 = arith.constant dense<0.000000e+00> : vector<8x8xf32>
    %41 = tpu.matmul %38, %39, %cst_20 {dimension_numbers = #tpu.dot_dimension_numbers<[1], [1], [0], [0], [0, 0, 1, 0], [], []>} : vector<8x8xf32>, vector<8x8xf32>, vector<8x8xf32> -> vector<8x8xf32>
    %cst_21 = arith.constant 0.353553385 : f32
    %42 = vector.broadcast %cst_21 : f32 to vector<8x8xf32>
    %43 = arith.mulf %41, %42 : vector<8x8xf32>
    %44 = vector.broadcast %37 : vector<1x8xf32> to vector<8x8xf32>
    %45 = arith.addf %43, %44 : vector<8x8xf32>
    %cst_22 = arith.constant dense<0xFF800000> : vector<8xf32>
    %46 = vector.multi_reduction <maximumf>, %45, %cst_22 [1] : vector<8x8xf32> to vector<8xf32>
    %47 = vector.shape_cast %46 : vector<8xf32> to vector<8x1xf32>
    %48 = vector.broadcast %47 : vector<8x1xf32> to vector<8x8xf32>
    %49 = arith.subf %45, %48 : vector<8x8xf32>
    %50 = math.exp %49 : vector<8x8xf32>
    %cst_23 = arith.constant dense<0.000000e+00> : vector<8xf32>
    %51 = vector.multi_reduction <add>, %50, %cst_23 [1] : vector<8x8xf32> to vector<8xf32>
    %52 = vector.shape_cast %51 : vector<8xf32> to vector<8x1xf32>
    %53 = tpu.reciprocal %52 {approx = true} : vector<8x1xf32> -> vector<8x1xf32>
    %54 = vector.broadcast %53 : vector<8x1xf32> to vector<8x8xf32>
    %55 = arith.mulf %50, %54 : vector<8x8xf32>
    %cst_24 = arith.constant dense<0.000000e+00> : vector<8x8xf32>
    %56 = tpu.matmul %55, %40, %cst_24 {dimension_numbers = #tpu.dot_dimension_numbers<[1], [0], [0], [1], [0, 0, 1, 1], [], []>} : vector<8x8xf32>, vector<8x8xf32>, vector<8x8xf32> -> vector<8x8xf32>
    %c0_25 = arith.constant 0 : index
    %c0_26 = arith.constant 0 : index
    %57 = vector.load %arg19[%c0_25, %c0_26] : memref<16x32xf32, #tpu.memory_space<vmem>>, vector<8x8xf32>
    tpu.vector_store %arg19[%c0_25, %c0_26], %56 {strides = array<i32>} : memref<16x32xf32, #tpu.memory_space<vmem>>, vector<8x8xf32>,
    %58 = vector.extract_strided_slice %36 {offsets = [0, 8], sizes = [8, 8], strides = [1, 1]} : vector<16x96xf32> to vector<8x8xf32>
    %59 = vector.extract_strided_slice %36 {offsets = [0, 40], sizes = [8, 8], strides = [1, 1]} : vector<16x96xf32> to vector<8x8xf32>
    %60 = vector.extract_strided_slice %36 {offsets = [0, 72], sizes = [8, 8], strides = [1, 1]} : vector<16x96xf32> to vector<8x8xf32>
    %cst_27 = arith.constant dense<0.000000e+00> : vector<8x8xf32>
    %61 = tpu.matmul %58, %59, %cst_27 {dimension_numbers = #tpu.dot_dimension_numbers<[1], [1], [0], [0], [0, 0, 1, 0], [], []>} : vector<8x8xf32>, vector<8x8xf32>, vector<8x8xf32> -> vector<8x8xf32>
    %cst_28 = arith.constant 0.353553385 : f32
    %62 = vector.broadcast %cst_28 : f32 to vector<8x8xf32>
    %63 = arith.mulf %61, %62 : vector<8x8xf32>
    %64 = vector.broadcast %37 : vector<1x8xf32> to vector<8x8xf32>
    %65 = arith.addf %63, %64 : vector<8x8xf32>
    %cst_29 = arith.constant dense<0xFF800000> : vector<8xf32>
    %66 = vector.multi_reduction <maximumf>, %65, %cst_29 [1] : vector<8x8xf32> to vector<8xf32>
    %67 = vector.shape_cast %66 : vector<8xf32> to vector<8x1xf32>
    %68 = vector.broadcast %67 : vector<8x1xf32> to vector<8x8xf32>
    %69 = arith.subf %65, %68 : vector<8x8xf32>
    %70 = math.exp %69 : vector<8x8xf32>
    %cst_30 = arith.constant dense<0.000000e+00> : vector<8xf32>
    %71 = vector.multi_reduction <add>, %70, %cst_30 [1] : vector<8x8xf32> to vector<8xf32>
    %72 = vector.shape_cast %71 : vector<8xf32> to vector<8x1xf32>
    %73 = tpu.reciprocal %72 {approx = true} : vector<8x1xf32> -> vector<8x1xf32>
    %74 = vector.broadcast %73 : vector<8x1xf32> to vector<8x8xf32>
    %75 = arith.mulf %70, %74 : vector<8x8xf32>
    %cst_31 = arith.constant dense<0.000000e+00> : vector<8x8xf32>
    %76 = tpu.matmul %75, %60, %cst_31 {dimension_numbers = #tpu.dot_dimension_numbers<[1], [0], [0], [1], [0, 0, 1, 1], [], []>} : vector<8x8xf32>, vector<8x8xf32>, vector<8x8xf32> -> vector<8x8xf32>
    %c0_32 = arith.constant 0 : index
    %c8 = arith.constant 8 : index
    %77 = vector.load %arg19[%c0_32, %c8] : memref<16x32xf32, #tpu.memory_space<vmem>>, vector<8x8xf32>
    tpu.vector_store %arg19[%c0_32, %c8], %76 {strides = array<i32>} : memref<16x32xf32, #tpu.memory_space<vmem>>, vector<8x8xf32>,
    %78 = vector.extract_strided_slice %36 {offsets = [0, 16], sizes = [8, 8], strides = [1, 1]} : vector<16x96xf32> to vector<8x8xf32>
    %79 = vector.extract_strided_slice %36 {offsets = [0, 48], sizes = [8, 8], strides = [1, 1]} : vector<16x96xf32> to vector<8x8xf32>
    %80 = vector.extract_strided_slice %36 {offsets = [0, 80], sizes = [8, 8], strides = [1, 1]} : vector<16x96xf32> to vector<8x8xf32>
    %cst_33 = arith.constant dense<0.000000e+00> : vector<8x8xf32>
    %81 = tpu.matmul %78, %79, %cst_33 {dimension_numbers = #tpu.dot_dimension_numbers<[1], [1], [0], [0], [0, 0, 1, 0], [], []>} : vector<8x8xf32>, vector<8x8xf32>, vector<8x8xf32> -> vector<8x8xf32>
    %cst_34 = arith.constant 0.353553385 : f32
    %82 = vector.broadcast %cst_34 : f32 to vector<8x8xf32>
    %83 = arith.mulf %81, %82 : vector<8x8xf32>
    %84 = vector.broadcast %37 : vector<1x8xf32> to vector<8x8xf32>
    %85 = arith.addf %83, %84 : vector<8x8xf32>
    %cst_35 = arith.constant dense<0xFF800000> : vector<8xf32>
    %86 = vector.multi_reduction <maximumf>, %85, %cst_35 [1] : vector<8x8xf32> to vector<8xf32>
    %87 = vector.shape_cast %86 : vector<8xf32> to vector<8x1xf32>
    %88 = vector.broadcast %87 : vector<8x1xf32> to vector<8x8xf32>
    %89 = arith.subf %85, %88 : vector<8x8xf32>
    %90 = math.exp %89 : vector<8x8xf32>
    %cst_36 = arith.constant dense<0.000000e+00> : vector<8xf32>
    %91 = vector.multi_reduction <add>, %90, %cst_36 [1] : vector<8x8xf32> to vector<8xf32>
    %92 = vector.shape_cast %91 : vector<8xf32> to vector<8x1xf32>
    %93 = tpu.reciprocal %92 {approx = true} : vector<8x1xf32> -> vector<8x1xf32>
    %94 = vector.broadcast %93 : vector<8x1xf32> to vector<8x8xf32>
    %95 = arith.mulf %90, %94 : vector<8x8xf32>
    %cst_37 = arith.constant dense<0.000000e+00> : vector<8x8xf32>
    %96 = tpu.matmul %95, %80, %cst_37 {dimension_numbers = #tpu.dot_dimension_numbers<[1], [0], [0], [1], [0, 0, 1, 1], [], []>} : vector<8x8xf32>, vector<8x8xf32>, vector<8x8xf32> -> vector<8x8xf32>
    %c0_38 = arith.constant 0 : index
    %c16 = arith.constant 16 : index
    %97 = vector.load %arg19[%c0_38, %c16] : memref<16x32xf32, #tpu.memory_space<vmem>>, vector<8x8xf32>
    tpu.vector_store %arg19[%c0_38, %c16], %96 {strides = array<i32>} : memref<16x32xf32, #tpu.memory_space<vmem>>, vector<8x8xf32>,
    %98 = vector.extract_strided_slice %36 {offsets = [0, 24], sizes = [8, 8], strides = [1, 1]} : vector<16x96xf32> to vector<8x8xf32>
    %99 = vector.extract_strided_slice %36 {offsets = [0, 56], sizes = [8, 8], strides = [1, 1]} : vector<16x96xf32> to vector<8x8xf32>
    %100 = vector.extract_strided_slice %36 {offsets = [0, 88], sizes = [8, 8], strides = [1, 1]} : vector<16x96xf32> to vector<8x8xf32>
    %cst_39 = arith.constant dense<0.000000e+00> : vector<8x8xf32>
    %101 = tpu.matmul %98, %99, %cst_39 {dimension_numbers = #tpu.dot_dimension_numbers<[1], [1], [0], [0], [0, 0, 1, 0], [], []>} : vector<8x8xf32>, vector<8x8xf32>, vector<8x8xf32> -> vector<8x8xf32>
    %cst_40 = arith.constant 0.353553385 : f32
    %102 = vector.broadcast %cst_40 : f32 to vector<8x8xf32>
    %103 = arith.mulf %101, %102 : vector<8x8xf32>
    %104 = vector.broadcast %37 : vector<1x8xf32> to vector<8x8xf32>
    %105 = arith.addf %103, %104 : vector<8x8xf32>
    %cst_41 = arith.constant dense<0xFF800000> : vector<8xf32>
    %106 = vector.multi_reduction <maximumf>, %105, %cst_41 [1] : vector<8x8xf32> to vector<8xf32>
    %107 = vector.shape_cast %106 : vector<8xf32> to vector<8x1xf32>
    %108 = vector.broadcast %107 : vector<8x1xf32> to vector<8x8xf32>
    %109 = arith.subf %105, %108 : vector<8x8xf32>
    %110 = math.exp %109 : vector<8x8xf32>
    %cst_42 = arith.constant dense<0.000000e+00> : vector<8xf32>
    %111 = vector.multi_reduction <add>, %110, %cst_42 [1] : vector<8x8xf32> to vector<8xf32>
    %112 = vector.shape_cast %111 : vector<8xf32> to vector<8x1xf32>
    %113 = tpu.reciprocal %112 {approx = true} : vector<8x1xf32> -> vector<8x1xf32>
    %114 = vector.broadcast %113 : vector<8x1xf32> to vector<8x8xf32>
    %115 = arith.mulf %110, %114 : vector<8x8xf32>
    %cst_43 = arith.constant dense<0.000000e+00> : vector<8x8xf32>
    %116 = tpu.matmul %115, %100, %cst_43 {dimension_numbers = #tpu.dot_dimension_numbers<[1], [0], [0], [1], [0, 0, 1, 1], [], []>} : vector<8x8xf32>, vector<8x8xf32>, vector<8x8xf32> -> vector<8x8xf32>
    %c0_44 = arith.constant 0 : index
    %c24 = arith.constant 24 : index
    %117 = vector.load %arg19[%c0_44, %c24] : memref<16x32xf32, #tpu.memory_space<vmem>>, vector<8x8xf32>
    tpu.vector_store %arg19[%c0_44, %c24], %116 {strides = array<i32>} : memref<16x32xf32, #tpu.memory_space<vmem>>, vector<8x8xf32>,
    %118 = vector.extract_strided_slice %4 {offsets = [1, 0], sizes = [1, 8], strides = [1, 1]} : vector<2x8xf32> to vector<1x8xf32>
    %119 = vector.extract_strided_slice %36 {offsets = [8, 0], sizes = [8, 8], strides = [1, 1]} : vector<16x96xf32> to vector<8x8xf32>
    %120 = vector.extract_strided_slice %36 {offsets = [8, 32], sizes = [8, 8], strides = [1, 1]} : vector<16x96xf32> to vector<8x8xf32>
    %121 = vector.extract_strided_slice %36 {offsets = [8, 64], sizes = [8, 8], strides = [1, 1]} : vector<16x96xf32> to vector<8x8xf32>
    %cst_45 = arith.constant dense<0.000000e+00> : vector<8x8xf32>
    %122 = tpu.matmul %119, %120, %cst_45 {dimension_numbers = #tpu.dot_dimension_numbers<[1], [1], [0], [0], [0, 0, 1, 0], [], []>} : vector<8x8xf32>, vector<8x8xf32>, vector<8x8xf32> -> vector<8x8xf32>
    %cst_46 = arith.constant 0.353553385 : f32
    %123 = vector.broadcast %cst_46 : f32 to vector<8x8xf32>
    %124 = arith.mulf %122, %123 : vector<8x8xf32>
    %125 = vector.broadcast %118 : vector<1x8xf32> to vector<8x8xf32>
    %126 = arith.addf %124, %125 : vector<8x8xf32>
    %cst_47 = arith.constant dense<0xFF800000> : vector<8xf32>
    %127 = vector.multi_reduction <maximumf>, %126, %cst_47 [1] : vector<8x8xf32> to vector<8xf32>
    %128 = vector.shape_cast %127 : vector<8xf32> to vector<8x1xf32>
    %129 = vector.broadcast %128 : vector<8x1xf32> to vector<8x8xf32>
    %130 = arith.subf %126, %129 : vector<8x8xf32>
    %131 = math.exp %130 : vector<8x8xf32>
    %cst_48 = arith.constant dense<0.000000e+00> : vector<8xf32>
    %132 = vector.multi_reduction <add>, %131, %cst_48 [1] : vector<8x8xf32> to vector<8xf32>
    %133 = vector.shape_cast %132 : vector<8xf32> to vector<8x1xf32>
    %134 = tpu.reciprocal %133 {approx = true} : vector<8x1xf32> -> vector<8x1xf32>
    %135 = vector.broadcast %134 : vector<8x1xf32> to vector<8x8xf32>
    %136 = arith.mulf %131, %135 : vector<8x8xf32>
    %cst_49 = arith.constant dense<0.000000e+00> : vector<8x8xf32>
    %137 = tpu.matmul %136, %121, %cst_49 {dimension_numbers = #tpu.dot_dimension_numbers<[1], [0], [0], [1], [0, 0, 1, 1], [], []>} : vector<8x8xf32>, vector<8x8xf32>, vector<8x8xf32> -> vector<8x8xf32>
    %c8_50 = arith.constant 8 : index
    %c0_51 = arith.constant 0 : index
    %138 = vector.load %arg19[%c8_50, %c0_51] : memref<16x32xf32, #tpu.memory_space<vmem>>, vector<8x8xf32>
    tpu.vector_store %arg19[%c8_50, %c0_51], %137 {strides = array<i32>} : memref<16x32xf32, #tpu.memory_space<vmem>>, vector<8x8xf32>,
    %139 = vector.extract_strided_slice %36 {offsets = [8, 8], sizes = [8, 8], strides = [1, 1]} : vector<16x96xf32> to vector<8x8xf32>
    %140 = vector.extract_strided_slice %36 {offsets = [8, 40], sizes = [8, 8], strides = [1, 1]} : vector<16x96xf32> to vector<8x8xf32>
    %141 = vector.extract_strided_slice %36 {offsets = [8, 72], sizes = [8, 8], strides = [1, 1]} : vector<16x96xf32> to vector<8x8xf32>
    %cst_52 = arith.constant dense<0.000000e+00> : vector<8x8xf32>
    %142 = tpu.matmul %139, %140, %cst_52 {dimension_numbers = #tpu.dot_dimension_numbers<[1], [1], [0], [0], [0, 0, 1, 0], [], []>} : vector<8x8xf32>, vector<8x8xf32>, vector<8x8xf32> -> vector<8x8xf32>
    %cst_53 = arith.constant 0.353553385 : f32
    %143 = vector.broadcast %cst_53 : f32 to vector<8x8xf32>
    %144 = arith.mulf %142, %143 : vector<8x8xf32>
    %145 = vector.broadcast %118 : vector<1x8xf32> to vector<8x8xf32>
    %146 = arith.addf %144, %145 : vector<8x8xf32>
    %cst_54 = arith.constant dense<0xFF800000> : vector<8xf32>
    %147 = vector.multi_reduction <maximumf>, %146, %cst_54 [1] : vector<8x8xf32> to vector<8xf32>
    %148 = vector.shape_cast %147 : vector<8xf32> to vector<8x1xf32>
    %149 = vector.broadcast %148 : vector<8x1xf32> to vector<8x8xf32>
    %150 = arith.subf %146, %149 : vector<8x8xf32>
    %151 = math.exp %150 : vector<8x8xf32>
    %cst_55 = arith.constant dense<0.000000e+00> : vector<8xf32>
    %152 = vector.multi_reduction <add>, %151, %cst_55 [1] : vector<8x8xf32> to vector<8xf32>
    %153 = vector.shape_cast %152 : vector<8xf32> to vector<8x1xf32>
    %154 = tpu.reciprocal %153 {approx = true} : vector<8x1xf32> -> vector<8x1xf32>
    %155 = vector.broadcast %154 : vector<8x1xf32> to vector<8x8xf32>
    %156 = arith.mulf %151, %155 : vector<8x8xf32>
    %cst_56 = arith.constant dense<0.000000e+00> : vector<8x8xf32>
    %157 = tpu.matmul %156, %141, %cst_56 {dimension_numbers = #tpu.dot_dimension_numbers<[1], [0], [0], [1], [0, 0, 1, 1], [], []>} : vector<8x8xf32>, vector<8x8xf32>, vector<8x8xf32> -> vector<8x8xf32>
    %c8_57 = arith.constant 8 : index
    %c8_58 = arith.constant 8 : index
    %158 = vector.load %arg19[%c8_57, %c8_58] : memref<16x32xf32, #tpu.memory_space<vmem>>, vector<8x8xf32>
    tpu.vector_store %arg19[%c8_57, %c8_58], %157 {strides = array<i32>} : memref<16x32xf32, #tpu.memory_space<vmem>>, vector<8x8xf32>,
    %159 = vector.extract_strided_slice %36 {offsets = [8, 16], sizes = [8, 8], strides = [1, 1]} : vector<16x96xf32> to vector<8x8xf32>
    %160 = vector.extract_strided_slice %36 {offsets = [8, 48], sizes = [8, 8], strides = [1, 1]} : vector<16x96xf32> to vector<8x8xf32>
    %161 = vector.extract_strided_slice %36 {offsets = [8, 80], sizes = [8, 8], strides = [1, 1]} : vector<16x96xf32> to vector<8x8xf32>
    %cst_59 = arith.constant dense<0.000000e+00> : vector<8x8xf32>
    %162 = tpu.matmul %159, %160, %cst_59 {dimension_numbers = #tpu.dot_dimension_numbers<[1], [1], [0], [0], [0, 0, 1, 0], [], []>} : vector<8x8xf32>, vector<8x8xf32>, vector<8x8xf32> -> vector<8x8xf32>
    %cst_60 = arith.constant 0.353553385 : f32
    %163 = vector.broadcast %cst_60 : f32 to vector<8x8xf32>
    %164 = arith.mulf %162, %163 : vector<8x8xf32>
    %165 = vector.broadcast %118 : vector<1x8xf32> to vector<8x8xf32>
    %166 = arith.addf %164, %165 : vector<8x8xf32>
    %cst_61 = arith.constant dense<0xFF800000> : vector<8xf32>
    %167 = vector.multi_reduction <maximumf>, %166, %cst_61 [1] : vector<8x8xf32> to vector<8xf32>
    %168 = vector.shape_cast %167 : vector<8xf32> to vector<8x1xf32>
    %169 = vector.broadcast %168 : vector<8x1xf32> to vector<8x8xf32>
    %170 = arith.subf %166, %169 : vector<8x8xf32>
    %171 = math.exp %170 : vector<8x8xf32>
    %cst_62 = arith.constant dense<0.000000e+00> : vector<8xf32>
    %172 = vector.multi_reduction <add>, %171, %cst_62 [1] : vector<8x8xf32> to vector<8xf32>
    %173 = vector.shape_cast %172 : vector<8xf32> to vector<8x1xf32>
    %174 = tpu.reciprocal %173 {approx = true} : vector<8x1xf32> -> vector<8x1xf32>
    %175 = vector.broadcast %174 : vector<8x1xf32> to vector<8x8xf32>
    %176 = arith.mulf %171, %175 : vector<8x8xf32>
    %cst_63 = arith.constant dense<0.000000e+00> : vector<8x8xf32>
    %177 = tpu.matmul %176, %161, %cst_63 {dimension_numbers = #tpu.dot_dimension_numbers<[1], [0], [0], [1], [0, 0, 1, 1], [], []>} : vector<8x8xf32>, vector<8x8xf32>, vector<8x8xf32> -> vector<8x8xf32>
    %c8_64 = arith.constant 8 : index
    %c16_65 = arith.constant 16 : index
    %178 = vector.load %arg19[%c8_64, %c16_65] : memref<16x32xf32, #tpu.memory_space<vmem>>, vector<8x8xf32>
    tpu.vector_store %arg19[%c8_64, %c16_65], %177 {strides = array<i32>} : memref<16x32xf32, #tpu.memory_space<vmem>>, vector<8x8xf32>,
    %179 = vector.extract_strided_slice %36 {offsets = [8, 24], sizes = [8, 8], strides = [1, 1]} : vector<16x96xf32> to vector<8x8xf32>
    %180 = vector.extract_strided_slice %36 {offsets = [8, 56], sizes = [8, 8], strides = [1, 1]} : vector<16x96xf32> to vector<8x8xf32>
    %181 = vector.extract_strided_slice %36 {offsets = [8, 88], sizes = [8, 8], strides = [1, 1]} : vector<16x96xf32> to vector<8x8xf32>
    %cst_66 = arith.constant dense<0.000000e+00> : vector<8x8xf32>
    %182 = tpu.matmul %179, %180, %cst_66 {dimension_numbers = #tpu.dot_dimension_numbers<[1], [1], [0], [0], [0, 0, 1, 0], [], []>} : vector<8x8xf32>, vector<8x8xf32>, vector<8x8xf32> -> vector<8x8xf32>
    %cst_67 = arith.constant 0.353553385 : f32
    %183 = vector.broadcast %cst_67 : f32 to vector<8x8xf32>
    %184 = arith.mulf %182, %183 : vector<8x8xf32>
    %185 = vector.broadcast %118 : vector<1x8xf32> to vector<8x8xf32>
    %186 = arith.addf %184, %185 : vector<8x8xf32>
    %cst_68 = arith.constant dense<0xFF800000> : vector<8xf32>
    %187 = vector.multi_reduction <maximumf>, %186, %cst_68 [1] : vector<8x8xf32> to vector<8xf32>
    %188 = vector.shape_cast %187 : vector<8xf32> to vector<8x1xf32>
    %189 = vector.broadcast %188 : vector<8x1xf32> to vector<8x8xf32>
    %190 = arith.subf %186, %189 : vector<8x8xf32>
    %191 = math.exp %190 : vector<8x8xf32>
    %cst_69 = arith.constant dense<0.000000e+00> : vector<8xf32>
    %192 = vector.multi_reduction <add>, %191, %cst_69 [1] : vector<8x8xf32> to vector<8xf32>
    %193 = vector.shape_cast %192 : vector<8xf32> to vector<8x1xf32>
    %194 = tpu.reciprocal %193 {approx = true} : vector<8x1xf32> -> vector<8x1xf32>
    %195 = vector.broadcast %194 : vector<8x1xf32> to vector<8x8xf32>
    %196 = arith.mulf %191, %195 : vector<8x8xf32>
    %cst_70 = arith.constant dense<0.000000e+00> : vector<8x8xf32>
    %197 = tpu.matmul %196, %181, %cst_70 {dimension_numbers = #tpu.dot_dimension_numbers<[1], [0], [0], [1], [0, 0, 1, 1], [], []>} : vector<8x8xf32>, vector<8x8xf32>, vector<8x8xf32> -> vector<8x8xf32>
    %c8_71 = arith.constant 8 : index
    %c24_72 = arith.constant 24 : index
    %198 = vector.load %arg19[%c8_71, %c24_72] : memref<16x32xf32, #tpu.memory_space<vmem>>, vector<8x8xf32>
    tpu.vector_store %arg19[%c8_71, %c24_72], %197 {strides = array<i32>} : memref<16x32xf32, #tpu.memory_space<vmem>>, vector<8x8xf32>,
    %c0_73 = arith.constant 0 : index
    %c0_74 = arith.constant 0 : index
    %199 = vector.load %arg19[%c0_73, %c0_74] : memref<16x32xf32, #tpu.memory_space<vmem>>, vector<16x32xf32>
    %c0_75 = arith.constant 0 : index
    %c0_76 = arith.constant 0 : index
    %c0_77 = arith.constant 0 : index
    %200 = vector.load %arg6[%c0_75, %c0_76, %c0_77] : memref<2x32x32xf32, #tpu.memory_space<vmem>>, vector<1x32x32xf32>
    %201 = vector.shape_cast %200 : vector<1x32x32xf32> to vector<32x32xf32>
    %cst_78 = arith.constant dense<0.000000e+00> : vector<16x32xf32>
    %202 = tpu.matmul %199, %201, %cst_78 {dimension_numbers = #tpu.dot_dimension_numbers<[1], [0], [0], [1], [0, 0, 1, 1], [], []>} : vector<16x32xf32>, vector<32x32xf32>, vector<16x32xf32> -> vector<16x32xf32>
    %c0_79 = arith.constant 0 : index
    %c0_80 = arith.constant 0 : index
    %c0_81 = arith.constant 0 : index
    %203 = vector.load %arg7[%c0_79, %c0_80, %c0_81] : memref<2x1x32xf32, #tpu.memory_space<vmem>>, vector<1x1x32xf32>
    %204 = vector.shape_cast %203 : vector<1x1x32xf32> to vector<1x32xf32>
    %205 = vector.broadcast %204 : vector<1x32xf32> to vector<16x32xf32>
    %206 = arith.addf %202, %205 : vector<16x32xf32>
    %207 = arith.addf %206, %29 : vector<16x32xf32>
    %c0_82 = arith.constant 0 : index
    %c0_83 = arith.constant 0 : index
    %c0_84 = arith.constant 0 : index
    %208 = vector.load %arg8[%c0_82, %c0_83, %c0_84] : memref<2x1x32xf32, #tpu.memory_space<vmem>>, vector<1x1x32xf32>
    %209 = vector.shape_cast %208 : vector<1x1x32xf32> to vector<1x32xf32>
    %c0_85 = arith.constant 0 : index
    %c0_86 = arith.constant 0 : index
    %c0_87 = arith.constant 0 : index
    %210 = vector.load %arg9[%c0_85, %c0_86, %c0_87] : memref<2x1x32xf32, #tpu.memory_space<vmem>>, vector<1x1x32xf32>
    %211 = vector.shape_cast %210 : vector<1x1x32xf32> to vector<1x32xf32>
    %cst_88 = arith.constant dense<0.000000e+00> : vector<16xf32>
    %212 = vector.multi_reduction <add>, %207, %cst_88 [1] : vector<16x32xf32> to vector<16xf32>
    %213 = vector.shape_cast %212 : vector<16xf32> to vector<16x1xf32>
    %cst_89 = arith.constant 3.200000e+01 : f32
    %214 = vector.broadcast %cst_89 : f32 to vector<16x1xf32>
    %215 = arith.divf %213, %214 : vector<16x1xf32>
    %216 = vector.broadcast %215 : vector<16x1xf32> to vector<16x32xf32>
    %217 = arith.subf %207, %216 : vector<16x32xf32>
    %218 = arith.mulf %217, %217 : vector<16x32xf32>
    %cst_90 = arith.constant dense<0.000000e+00> : vector<16xf32>
    %219 = vector.multi_reduction <add>, %218, %cst_90 [1] : vector<16x32xf32> to vector<16xf32>
    %220 = vector.shape_cast %219 : vector<16xf32> to vector<16x1xf32>
    %cst_91 = arith.constant 3.200000e+01 : f32
    %221 = vector.broadcast %cst_91 : f32 to vector<16x1xf32>
    %222 = arith.divf %220, %221 : vector<16x1xf32>
    %cst_92 = arith.constant 9.99999996E-13 : f32
    %223 = vector.broadcast %cst_92 : f32 to vector<16x1xf32>
    %224 = arith.addf %222, %223 : vector<16x1xf32>
    %225 = math.rsqrt %224 : vector<16x1xf32>
    %226 = vector.broadcast %215 : vector<16x1xf32> to vector<16x32xf32>
    %227 = arith.subf %207, %226 : vector<16x32xf32>
    %228 = vector.broadcast %225 : vector<16x1xf32> to vector<16x32xf32>
    %229 = arith.mulf %227, %228 : vector<16x32xf32>
    %230 = vector.broadcast %209 : vector<1x32xf32> to vector<16x32xf32>
    %231 = arith.mulf %229, %230 : vector<16x32xf32>
    %232 = vector.broadcast %211 : vector<1x32xf32> to vector<16x32xf32>
    %233 = arith.addf %231, %232 : vector<16x32xf32>
    %c0_93 = arith.constant 0 : index
    %c0_94 = arith.constant 0 : index
    %c0_95 = arith.constant 0 : index
    %234 = vector.load %arg10[%c0_93, %c0_94, %c0_95] : memref<2x32x64xf32, #tpu.memory_space<vmem>>, vector<1x32x64xf32>
    %235 = vector.shape_cast %234 : vector<1x32x64xf32> to vector<32x64xf32>
    %cst_96 = arith.constant dense<0.000000e+00> : vector<16x64xf32>
    %236 = tpu.matmul %233, %235, %cst_96 {dimension_numbers = #tpu.dot_dimension_numbers<[1], [0], [0], [1], [0, 0, 1, 1], [], []>} : vector<16x32xf32>, vector<32x64xf32>, vector<16x64xf32> -> vector<16x64xf32>
    %c0_97 = arith.constant 0 : index
    %c0_98 = arith.constant 0 : index
    %c0_99 = arith.constant 0 : index
    %237 = vector.load %arg11[%c0_97, %c0_98, %c0_99] : memref<2x1x64xf32, #tpu.memory_space<vmem>>, vector<1x1x64xf32>
    %238 = vector.shape_cast %237 : vector<1x1x64xf32> to vector<1x64xf32>
    %239 = vector.broadcast %238 : vector<1x64xf32> to vector<16x64xf32>
    %240 = arith.addf %236, %239 : vector<16x64xf32>
    %cst_100 = arith.constant 5.000000e-01 : f32
    %241 = vector.broadcast %cst_100 : f32 to vector<16x64xf32>
    %242 = arith.mulf %241, %240 : vector<16x64xf32>
    %cst_101 = arith.constant 4.471500e-02 : f32
    %243 = vector.broadcast %cst_101 : f32 to vector<16x64xf32>
    %244 = arith.mulf %243, %240 : vector<16x64xf32>
    %245 = arith.mulf %244, %240 : vector<16x64xf32>
    %246 = arith.mulf %245, %240 : vector<16x64xf32>
    %247 = arith.addf %240, %246 : vector<16x64xf32>
    %cst_102 = arith.constant 0.797884583 : f32
    %248 = vector.broadcast %cst_102 : f32 to vector<16x64xf32>
    %249 = arith.mulf %248, %247 : vector<16x64xf32>
    %250 = math.tanh %249 : vector<16x64xf32>
    %cst_103 = arith.constant 1.000000e+00 : f32
    %251 = vector.broadcast %cst_103 : f32 to vector<16x64xf32>
    %252 = arith.addf %251, %250 : vector<16x64xf32>
    %253 = arith.mulf %242, %252 : vector<16x64xf32>
    %c0_104 = arith.constant 0 : index
    %c0_105 = arith.constant 0 : index
    %c0_106 = arith.constant 0 : index
    %254 = vector.load %arg12[%c0_104, %c0_105, %c0_106] : memref<2x64x32xf32, #tpu.memory_space<vmem>>, vector<1x64x32xf32>
    %255 = vector.shape_cast %254 : vector<1x64x32xf32> to vector<64x32xf32>
    %cst_107 = arith.constant dense<0.000000e+00> : vector<16x32xf32>
    %256 = tpu.matmul %253, %255, %cst_107 {dimension_numbers = #tpu.dot_dimension_numbers<[1], [0], [0], [1], [0, 0, 1, 1], [], []>} : vector<16x64xf32>, vector<64x32xf32>, vector<16x32xf32> -> vector<16x32xf32>
    %c0_108 = arith.constant 0 : index
    %c0_109 = arith.constant 0 : index
    %c0_110 = arith.constant 0 : index
    %257 = vector.load %arg13[%c0_108, %c0_109, %c0_110] : memref<2x1x32xf32, #tpu.memory_space<vmem>>, vector<1x1x32xf32>
    %258 = vector.shape_cast %257 : vector<1x1x32xf32> to vector<1x32xf32>
    %259 = vector.broadcast %258 : vector<1x32xf32> to vector<16x32xf32>
    %260 = arith.addf %256, %259 : vector<16x32xf32>
    %261 = arith.addf %260, %233 : vector<16x32xf32>
    %c0_111 = arith.constant 0 : index
    %c0_112 = arith.constant 0 : index
    %c0_113 = arith.constant 0 : index
    %262 = vector.load %arg14[%c0_111, %c0_112, %c0_113] : memref<2x1x32xf32, #tpu.memory_space<vmem>>, vector<1x1x32xf32>
    %263 = vector.shape_cast %262 : vector<1x1x32xf32> to vector<1x32xf32>
    %c0_114 = arith.constant 0 : index
    %c0_115 = arith.constant 0 : index
    %c0_116 = arith.constant 0 : index
    %264 = vector.load %arg15[%c0_114, %c0_115, %c0_116] : memref<2x1x32xf32, #tpu.memory_space<vmem>>, vector<1x1x32xf32>
    %265 = vector.shape_cast %264 : vector<1x1x32xf32> to vector<1x32xf32>
    %cst_117 = arith.constant dense<0.000000e+00> : vector<16xf32>
    %266 = vector.multi_reduction <add>, %261, %cst_117 [1] : vector<16x32xf32> to vector<16xf32>
    %267 = vector.shape_cast %266 : vector<16xf32> to vector<16x1xf32>
    %cst_118 = arith.constant 3.200000e+01 : f32
    %268 = vector.broadcast %cst_118 : f32 to vector<16x1xf32>
    %269 = arith.divf %267, %268 : vector<16x1xf32>
    %270 = vector.broadcast %269 : vector<16x1xf32> to vector<16x32xf32>
    %271 = arith.subf %261, %270 : vector<16x32xf32>
    %272 = arith.mulf %271, %271 : vector<16x32xf32>
    %cst_119 = arith.constant dense<0.000000e+00> : vector<16xf32>
    %273 = vector.multi_reduction <add>, %272, %cst_119 [1] : vector<16x32xf32> to vector<16xf32>
    %274 = vector.shape_cast %273 : vector<16xf32> to vector<16x1xf32>
    %cst_120 = arith.constant 3.200000e+01 : f32
    %275 = vector.broadcast %cst_120 : f32 to vector<16x1xf32>
    %276 = arith.divf %274, %275 : vector<16x1xf32>
    %cst_121 = arith.constant 9.99999996E-13 : f32
    %277 = vector.broadcast %cst_121 : f32 to vector<16x1xf32>
    %278 = arith.addf %276, %277 : vector<16x1xf32>
    %279 = math.rsqrt %278 : vector<16x1xf32>
    %280 = vector.broadcast %269 : vector<16x1xf32> to vector<16x32xf32>
    %281 = arith.subf %261, %280 : vector<16x32xf32>
    %282 = vector.broadcast %279 : vector<16x1xf32> to vector<16x32xf32>
    %283 = arith.mulf %281, %282 : vector<16x32xf32>
    %284 = vector.broadcast %263 : vector<1x32xf32> to vector<16x32xf32>
    %285 = arith.mulf %283, %284 : vector<16x32xf32>
    %286 = vector.broadcast %265 : vector<1x32xf32> to vector<16x32xf32>
    %287 = arith.addf %285, %286 : vector<16x32xf32>
    %c1 = arith.constant 1 : index
    %c0_122 = arith.constant 0 : index
    %c0_123 = arith.constant 0 : index
    %288 = vector.load %arg4[%c1, %c0_122, %c0_123] : memref<2x32x96xf32, #tpu.memory_space<vmem>>, vector<1x32x96xf32>
    %289 = vector.shape_cast %288 : vector<1x32x96xf32> to vector<32x96xf32>
    %cst_124 = arith.constant dense<0.000000e+00> : vector<16x96xf32>
    %290 = tpu.matmul %287, %289, %cst_124 {dimension_numbers = #tpu.dot_dimension_numbers<[1], [0], [0], [1], [0, 0, 1, 1], [], []>} : vector<16x32xf32>, vector<32x96xf32>, vector<16x96xf32> -> vector<16x96xf32>
    %c1_125 = arith.constant 1 : index
    %c0_126 = arith.constant 0 : index
    %c0_127 = arith.constant 0 : index
    %291 = vector.load %arg5[%c1_125, %c0_126, %c0_127] : memref<2x1x96xf32, #tpu.memory_space<vmem>>, vector<1x1x96xf32>
    %292 = vector.shape_cast %291 : vector<1x1x96xf32> to vector<1x96xf32>
    %293 = vector.broadcast %292 : vector<1x96xf32> to vector<16x96xf32>
    %294 = arith.addf %290, %293 : vector<16x96xf32>
    %295 = vector.extract_strided_slice %4 {offsets = [0, 0], sizes = [1, 8], strides = [1, 1]} : vector<2x8xf32> to vector<1x8xf32>
    %296 = vector.extract_strided_slice %294 {offsets = [0, 0], sizes = [8, 8], strides = [1, 1]} : vector<16x96xf32> to vector<8x8xf32>
    %297 = vector.extract_strided_slice %294 {offsets = [0, 32], sizes = [8, 8], strides = [1, 1]} : vector<16x96xf32> to vector<8x8xf32>
    %298 = vector.extract_strided_slice %294 {offsets = [0, 64], sizes = [8, 8], strides = [1, 1]} : vector<16x96xf32> to vector<8x8xf32>
    %cst_128 = arith.constant dense<0.000000e+00> : vector<8x8xf32>
    %299 = tpu.matmul %296, %297, %cst_128 {dimension_numbers = #tpu.dot_dimension_numbers<[1], [1], [0], [0], [0, 0, 1, 0], [], []>} : vector<8x8xf32>, vector<8x8xf32>, vector<8x8xf32> -> vector<8x8xf32>
    %cst_129 = arith.constant 0.353553385 : f32
    %300 = vector.broadcast %cst_129 : f32 to vector<8x8xf32>
    %301 = arith.mulf %299, %300 : vector<8x8xf32>
    %302 = vector.broadcast %295 : vector<1x8xf32> to vector<8x8xf32>
    %303 = arith.addf %301, %302 : vector<8x8xf32>
    %cst_130 = arith.constant dense<0xFF800000> : vector<8xf32>
    %304 = vector.multi_reduction <maximumf>, %303, %cst_130 [1] : vector<8x8xf32> to vector<8xf32>
    %305 = vector.shape_cast %304 : vector<8xf32> to vector<8x1xf32>
    %306 = vector.broadcast %305 : vector<8x1xf32> to vector<8x8xf32>
    %307 = arith.subf %303, %306 : vector<8x8xf32>
    %308 = math.exp %307 : vector<8x8xf32>
    %cst_131 = arith.constant dense<0.000000e+00> : vector<8xf32>
    %309 = vector.multi_reduction <add>, %308, %cst_131 [1] : vector<8x8xf32> to vector<8xf32>
    %310 = vector.shape_cast %309 : vector<8xf32> to vector<8x1xf32>
    %311 = tpu.reciprocal %310 {approx = true} : vector<8x1xf32> -> vector<8x1xf32>
    %312 = vector.broadcast %311 : vector<8x1xf32> to vector<8x8xf32>
    %313 = arith.mulf %308, %312 : vector<8x8xf32>
    %cst_132 = arith.constant dense<0.000000e+00> : vector<8x8xf32>
    %314 = tpu.matmul %313, %298, %cst_132 {dimension_numbers = #tpu.dot_dimension_numbers<[1], [0], [0], [1], [0, 0, 1, 1], [], []>} : vector<8x8xf32>, vector<8x8xf32>, vector<8x8xf32> -> vector<8x8xf32>
    %c0_133 = arith.constant 0 : index
    %c0_134 = arith.constant 0 : index
    %315 = vector.load %arg19[%c0_133, %c0_134] : memref<16x32xf32, #tpu.memory_space<vmem>>, vector<8x8xf32>
    tpu.vector_store %arg19[%c0_133, %c0_134], %314 {strides = array<i32>} : memref<16x32xf32, #tpu.memory_space<vmem>>, vector<8x8xf32>,
    %316 = vector.extract_strided_slice %294 {offsets = [0, 8], sizes = [8, 8], strides = [1, 1]} : vector<16x96xf32> to vector<8x8xf32>
    %317 = vector.extract_strided_slice %294 {offsets = [0, 40], sizes = [8, 8], strides = [1, 1]} : vector<16x96xf32> to vector<8x8xf32>
    %318 = vector.extract_strided_slice %294 {offsets = [0, 72], sizes = [8, 8], strides = [1, 1]} : vector<16x96xf32> to vector<8x8xf32>
    %cst_135 = arith.constant dense<0.000000e+00> : vector<8x8xf32>
    %319 = tpu.matmul %316, %317, %cst_135 {dimension_numbers = #tpu.dot_dimension_numbers<[1], [1], [0], [0], [0, 0, 1, 0], [], []>} : vector<8x8xf32>, vector<8x8xf32>, vector<8x8xf32> -> vector<8x8xf32>
    %cst_136 = arith.constant 0.353553385 : f32
    %320 = vector.broadcast %cst_136 : f32 to vector<8x8xf32>
    %321 = arith.mulf %319, %320 : vector<8x8xf32>
    %322 = vector.broadcast %295 : vector<1x8xf32> to vector<8x8xf32>
    %323 = arith.addf %321, %322 : vector<8x8xf32>
    %cst_137 = arith.constant dense<0xFF800000> : vector<8xf32>
    %324 = vector.multi_reduction <maximumf>, %323, %cst_137 [1] : vector<8x8xf32> to vector<8xf32>
    %325 = vector.shape_cast %324 : vector<8xf32> to vector<8x1xf32>
    %326 = vector.broadcast %325 : vector<8x1xf32> to vector<8x8xf32>
    %327 = arith.subf %323, %326 : vector<8x8xf32>
    %328 = math.exp %327 : vector<8x8xf32>
    %cst_138 = arith.constant dense<0.000000e+00> : vector<8xf32>
    %329 = vector.multi_reduction <add>, %328, %cst_138 [1] : vector<8x8xf32> to vector<8xf32>
    %330 = vector.shape_cast %329 : vector<8xf32> to vector<8x1xf32>
    %331 = tpu.reciprocal %330 {approx = true} : vector<8x1xf32> -> vector<8x1xf32>
    %332 = vector.broadcast %331 : vector<8x1xf32> to vector<8x8xf32>
    %333 = arith.mulf %328, %332 : vector<8x8xf32>
    %cst_139 = arith.constant dense<0.000000e+00> : vector<8x8xf32>
    %334 = tpu.matmul %333, %318, %cst_139 {dimension_numbers = #tpu.dot_dimension_numbers<[1], [0], [0], [1], [0, 0, 1, 1], [], []>} : vector<8x8xf32>, vector<8x8xf32>, vector<8x8xf32> -> vector<8x8xf32>
    %c0_140 = arith.constant 0 : index
    %c8_141 = arith.constant 8 : index
    %335 = vector.load %arg19[%c0_140, %c8_141] : memref<16x32xf32, #tpu.memory_space<vmem>>, vector<8x8xf32>
    tpu.vector_store %arg19[%c0_140, %c8_141], %334 {strides = array<i32>} : memref<16x32xf32, #tpu.memory_space<vmem>>, vector<8x8xf32>,
    %336 = vector.extract_strided_slice %294 {offsets = [0, 16], sizes = [8, 8], strides = [1, 1]} : vector<16x96xf32> to vector<8x8xf32>
    %337 = vector.extract_strided_slice %294 {offsets = [0, 48], sizes = [8, 8], strides = [1, 1]} : vector<16x96xf32> to vector<8x8xf32>
    %338 = vector.extract_strided_slice %294 {offsets = [0, 80], sizes = [8, 8], strides = [1, 1]} : vector<16x96xf32> to vector<8x8xf32>
    %cst_142 = arith.constant dense<0.000000e+00> : vector<8x8xf32>
    %339 = tpu.matmul %336, %337, %cst_142 {dimension_numbers = #tpu.dot_dimension_numbers<[1], [1], [0], [0], [0, 0, 1, 0], [], []>} : vector<8x8xf32>, vector<8x8xf32>, vector<8x8xf32> -> vector<8x8xf32>
    %cst_143 = arith.constant 0.353553385 : f32
    %340 = vector.broadcast %cst_143 : f32 to vector<8x8xf32>
    %341 = arith.mulf %339, %340 : vector<8x8xf32>
    %342 = vector.broadcast %295 : vector<1x8xf32> to vector<8x8xf32>
    %343 = arith.addf %341, %342 : vector<8x8xf32>
    %cst_144 = arith.constant dense<0xFF800000> : vector<8xf32>
    %344 = vector.multi_reduction <maximumf>, %343, %cst_144 [1] : vector<8x8xf32> to vector<8xf32>
    %345 = vector.shape_cast %344 : vector<8xf32> to vector<8x1xf32>
    %346 = vector.broadcast %345 : vector<8x1xf32> to vector<8x8xf32>
    %347 = arith.subf %343, %346 : vector<8x8xf32>
    %348 = math.exp %347 : vector<8x8xf32>
    %cst_145 = arith.constant dense<0.000000e+00> : vector<8xf32>
    %349 = vector.multi_reduction <add>, %348, %cst_145 [1] : vector<8x8xf32> to vector<8xf32>
    %350 = vector.shape_cast %349 : vector<8xf32> to vector<8x1xf32>
    %351 = tpu.reciprocal %350 {approx = true} : vector<8x1xf32> -> vector<8x1xf32>
    %352 = vector.broadcast %351 : vector<8x1xf32> to vector<8x8xf32>
    %353 = arith.mulf %348, %352 : vector<8x8xf32>
    %cst_146 = arith.constant dense<0.000000e+00> : vector<8x8xf32>
    %354 = tpu.matmul %353, %338, %cst_146 {dimension_numbers = #tpu.dot_dimension_numbers<[1], [0], [0], [1], [0, 0, 1, 1], [], []>} : vector<8x8xf32>, vector<8x8xf32>, vector<8x8xf32> -> vector<8x8xf32>
    %c0_147 = arith.constant 0 : index
    %c16_148 = arith.constant 16 : index
    %355 = vector.load %arg19[%c0_147, %c16_148] : memref<16x32xf32, #tpu.memory_space<vmem>>, vector<8x8xf32>
    tpu.vector_store %arg19[%c0_147, %c16_148], %354 {strides = array<i32>} : memref<16x32xf32, #tpu.memory_space<vmem>>, vector<8x8xf32>,
    %356 = vector.extract_strided_slice %294 {offsets = [0, 24], sizes = [8, 8], strides = [1, 1]} : vector<16x96xf32> to vector<8x8xf32>
    %357 = vector.extract_strided_slice %294 {offsets = [0, 56], sizes = [8, 8], strides = [1, 1]} : vector<16x96xf32> to vector<8x8xf32>
    %358 = vector.extract_strided_slice %294 {offsets = [0, 88], sizes = [8, 8], strides = [1, 1]} : vector<16x96xf32> to vector<8x8xf32>
    %cst_149 = arith.constant dense<0.000000e+00> : vector<8x8xf32>
    %359 = tpu.matmul %356, %357, %cst_149 {dimension_numbers = #tpu.dot_dimension_numbers<[1], [1], [0], [0], [0, 0, 1, 0], [], []>} : vector<8x8xf32>, vector<8x8xf32>, vector<8x8xf32> -> vector<8x8xf32>
    %cst_150 = arith.constant 0.353553385 : f32
    %360 = vector.broadcast %cst_150 : f32 to vector<8x8xf32>
    %361 = arith.mulf %359, %360 : vector<8x8xf32>
    %362 = vector.broadcast %295 : vector<1x8xf32> to vector<8x8xf32>
    %363 = arith.addf %361, %362 : vector<8x8xf32>
    %cst_151 = arith.constant dense<0xFF800000> : vector<8xf32>
    %364 = vector.multi_reduction <maximumf>, %363, %cst_151 [1] : vector<8x8xf32> to vector<8xf32>
    %365 = vector.shape_cast %364 : vector<8xf32> to vector<8x1xf32>
    %366 = vector.broadcast %365 : vector<8x1xf32> to vector<8x8xf32>
    %367 = arith.subf %363, %366 : vector<8x8xf32>
    %368 = math.exp %367 : vector<8x8xf32>
    %cst_152 = arith.constant dense<0.000000e+00> : vector<8xf32>
    %369 = vector.multi_reduction <add>, %368, %cst_152 [1] : vector<8x8xf32> to vector<8xf32>
    %370 = vector.shape_cast %369 : vector<8xf32> to vector<8x1xf32>
    %371 = tpu.reciprocal %370 {approx = true} : vector<8x1xf32> -> vector<8x1xf32>
    %372 = vector.broadcast %371 : vector<8x1xf32> to vector<8x8xf32>
    %373 = arith.mulf %368, %372 : vector<8x8xf32>
    %cst_153 = arith.constant dense<0.000000e+00> : vector<8x8xf32>
    %374 = tpu.matmul %373, %358, %cst_153 {dimension_numbers = #tpu.dot_dimension_numbers<[1], [0], [0], [1], [0, 0, 1, 1], [], []>} : vector<8x8xf32>, vector<8x8xf32>, vector<8x8xf32> -> vector<8x8xf32>
    %c0_154 = arith.constant 0 : index
    %c24_155 = arith.constant 24 : index
    %375 = vector.load %arg19[%c0_154, %c24_155] : memref<16x32xf32, #tpu.memory_space<vmem>>, vector<8x8xf32>
    tpu.vector_store %arg19[%c0_154, %c24_155], %374 {strides = array<i32>} : memref<16x32xf32, #tpu.memory_space<vmem>>, vector<8x8xf32>,
    %376 = vector.extract_strided_slice %4 {offsets = [1, 0], sizes = [1, 8], strides = [1, 1]} : vector<2x8xf32> to vector<1x8xf32>
    %377 = vector.extract_strided_slice %294 {offsets = [8, 0], sizes = [8, 8], strides = [1, 1]} : vector<16x96xf32> to vector<8x8xf32>
    %378 = vector.extract_strided_slice %294 {offsets = [8, 32], sizes = [8, 8], strides = [1, 1]} : vector<16x96xf32> to vector<8x8xf32>
    %379 = vector.extract_strided_slice %294 {offsets = [8, 64], sizes = [8, 8], strides = [1, 1]} : vector<16x96xf32> to vector<8x8xf32>
    %cst_156 = arith.constant dense<0.000000e+00> : vector<8x8xf32>
    %380 = tpu.matmul %377, %378, %cst_156 {dimension_numbers = #tpu.dot_dimension_numbers<[1], [1], [0], [0], [0, 0, 1, 0], [], []>} : vector<8x8xf32>, vector<8x8xf32>, vector<8x8xf32> -> vector<8x8xf32>
    %cst_157 = arith.constant 0.353553385 : f32
    %381 = vector.broadcast %cst_157 : f32 to vector<8x8xf32>
    %382 = arith.mulf %380, %381 : vector<8x8xf32>
    %383 = vector.broadcast %376 : vector<1x8xf32> to vector<8x8xf32>
    %384 = arith.addf %382, %383 : vector<8x8xf32>
    %cst_158 = arith.constant dense<0xFF800000> : vector<8xf32>
    %385 = vector.multi_reduction <maximumf>, %384, %cst_158 [1] : vector<8x8xf32> to vector<8xf32>
    %386 = vector.shape_cast %385 : vector<8xf32> to vector<8x1xf32>
    %387 = vector.broadcast %386 : vector<8x1xf32> to vector<8x8xf32>
    %388 = arith.subf %384, %387 : vector<8x8xf32>
    %389 = math.exp %388 : vector<8x8xf32>
    %cst_159 = arith.constant dense<0.000000e+00> : vector<8xf32>
    %390 = vector.multi_reduction <add>, %389, %cst_159 [1] : vector<8x8xf32> to vector<8xf32>
    %391 = vector.shape_cast %390 : vector<8xf32> to vector<8x1xf32>
    %392 = tpu.reciprocal %391 {approx = true} : vector<8x1xf32> -> vector<8x1xf32>
    %393 = vector.broadcast %392 : vector<8x1xf32> to vector<8x8xf32>
    %394 = arith.mulf %389, %393 : vector<8x8xf32>
    %cst_160 = arith.constant dense<0.000000e+00> : vector<8x8xf32>
    %395 = tpu.matmul %394, %379, %cst_160 {dimension_numbers = #tpu.dot_dimension_numbers<[1], [0], [0], [1], [0, 0, 1, 1], [], []>} : vector<8x8xf32>, vector<8x8xf32>, vector<8x8xf32> -> vector<8x8xf32>
    %c8_161 = arith.constant 8 : index
    %c0_162 = arith.constant 0 : index
    %396 = vector.load %arg19[%c8_161, %c0_162] : memref<16x32xf32, #tpu.memory_space<vmem>>, vector<8x8xf32>
    tpu.vector_store %arg19[%c8_161, %c0_162], %395 {strides = array<i32>} : memref<16x32xf32, #tpu.memory_space<vmem>>, vector<8x8xf32>,
    %397 = vector.extract_strided_slice %294 {offsets = [8, 8], sizes = [8, 8], strides = [1, 1]} : vector<16x96xf32> to vector<8x8xf32>
    %398 = vector.extract_strided_slice %294 {offsets = [8, 40], sizes = [8, 8], strides = [1, 1]} : vector<16x96xf32> to vector<8x8xf32>
    %399 = vector.extract_strided_slice %294 {offsets = [8, 72], sizes = [8, 8], strides = [1, 1]} : vector<16x96xf32> to vector<8x8xf32>
    %cst_163 = arith.constant dense<0.000000e+00> : vector<8x8xf32>
    %400 = tpu.matmul %397, %398, %cst_163 {dimension_numbers = #tpu.dot_dimension_numbers<[1], [1], [0], [0], [0, 0, 1, 0], [], []>} : vector<8x8xf32>, vector<8x8xf32>, vector<8x8xf32> -> vector<8x8xf32>
    %cst_164 = arith.constant 0.353553385 : f32
    %401 = vector.broadcast %cst_164 : f32 to vector<8x8xf32>
    %402 = arith.mulf %400, %401 : vector<8x8xf32>
    %403 = vector.broadcast %376 : vector<1x8xf32> to vector<8x8xf32>
    %404 = arith.addf %402, %403 : vector<8x8xf32>
    %cst_165 = arith.constant dense<0xFF800000> : vector<8xf32>
    %405 = vector.multi_reduction <maximumf>, %404, %cst_165 [1] : vector<8x8xf32> to vector<8xf32>
    %406 = vector.shape_cast %405 : vector<8xf32> to vector<8x1xf32>
    %407 = vector.broadcast %406 : vector<8x1xf32> to vector<8x8xf32>
    %408 = arith.subf %404, %407 : vector<8x8xf32>
    %409 = math.exp %408 : vector<8x8xf32>
    %cst_166 = arith.constant dense<0.000000e+00> : vector<8xf32>
    %410 = vector.multi_reduction <add>, %409, %cst_166 [1] : vector<8x8xf32> to vector<8xf32>
    %411 = vector.shape_cast %410 : vector<8xf32> to vector<8x1xf32>
    %412 = tpu.reciprocal %411 {approx = true} : vector<8x1xf32> -> vector<8x1xf32>
    %413 = vector.broadcast %412 : vector<8x1xf32> to vector<8x8xf32>
    %414 = arith.mulf %409, %413 : vector<8x8xf32>
    %cst_167 = arith.constant dense<0.000000e+00> : vector<8x8xf32>
    %415 = tpu.matmul %414, %399, %cst_167 {dimension_numbers = #tpu.dot_dimension_numbers<[1], [0], [0], [1], [0, 0, 1, 1], [], []>} : vector<8x8xf32>, vector<8x8xf32>, vector<8x8xf32> -> vector<8x8xf32>
    %c8_168 = arith.constant 8 : index
    %c8_169 = arith.constant 8 : index
    %416 = vector.load %arg19[%c8_168, %c8_169] : memref<16x32xf32, #tpu.memory_space<vmem>>, vector<8x8xf32>
    tpu.vector_store %arg19[%c8_168, %c8_169], %415 {strides = array<i32>} : memref<16x32xf32, #tpu.memory_space<vmem>>, vector<8x8xf32>,
    %417 = vector.extract_strided_slice %294 {offsets = [8, 16], sizes = [8, 8], strides = [1, 1]} : vector<16x96xf32> to vector<8x8xf32>
    %418 = vector.extract_strided_slice %294 {offsets = [8, 48], sizes = [8, 8], strides = [1, 1]} : vector<16x96xf32> to vector<8x8xf32>
    %419 = vector.extract_strided_slice %294 {offsets = [8, 80], sizes = [8, 8], strides = [1, 1]} : vector<16x96xf32> to vector<8x8xf32>
    %cst_170 = arith.constant dense<0.000000e+00> : vector<8x8xf32>
    %420 = tpu.matmul %417, %418, %cst_170 {dimension_numbers = #tpu.dot_dimension_numbers<[1], [1], [0], [0], [0, 0, 1, 0], [], []>} : vector<8x8xf32>, vector<8x8xf32>, vector<8x8xf32> -> vector<8x8xf32>
    %cst_171 = arith.constant 0.353553385 : f32
    %421 = vector.broadcast %cst_171 : f32 to vector<8x8xf32>
    %422 = arith.mulf %420, %421 : vector<8x8xf32>
    %423 = vector.broadcast %376 : vector<1x8xf32> to vector<8x8xf32>
    %424 = arith.addf %422, %423 : vector<8x8xf32>
    %cst_172 = arith.constant dense<0xFF800000> : vector<8xf32>
    %425 = vector.multi_reduction <maximumf>, %424, %cst_172 [1] : vector<8x8xf32> to vector<8xf32>
    %426 = vector.shape_cast %425 : vector<8xf32> to vector<8x1xf32>
    %427 = vector.broadcast %426 : vector<8x1xf32> to vector<8x8xf32>
    %428 = arith.subf %424, %427 : vector<8x8xf32>
    %429 = math.exp %428 : vector<8x8xf32>
    %cst_173 = arith.constant dense<0.000000e+00> : vector<8xf32>
    %430 = vector.multi_reduction <add>, %429, %cst_173 [1] : vector<8x8xf32> to vector<8xf32>
    %431 = vector.shape_cast %430 : vector<8xf32> to vector<8x1xf32>
    %432 = tpu.reciprocal %431 {approx = true} : vector<8x1xf32> -> vector<8x1xf32>
    %433 = vector.broadcast %432 : vector<8x1xf32> to vector<8x8xf32>
    %434 = arith.mulf %429, %433 : vector<8x8xf32>
    %cst_174 = arith.constant dense<0.000000e+00> : vector<8x8xf32>
    %435 = tpu.matmul %434, %419, %cst_174 {dimension_numbers = #tpu.dot_dimension_numbers<[1], [0], [0], [1], [0, 0, 1, 1], [], []>} : vector<8x8xf32>, vector<8x8xf32>, vector<8x8xf32> -> vector<8x8xf32>
    %c8_175 = arith.constant 8 : index
    %c16_176 = arith.constant 16 : index
    %436 = vector.load %arg19[%c8_175, %c16_176] : memref<16x32xf32, #tpu.memory_space<vmem>>, vector<8x8xf32>
    tpu.vector_store %arg19[%c8_175, %c16_176], %435 {strides = array<i32>} : memref<16x32xf32, #tpu.memory_space<vmem>>, vector<8x8xf32>,
    %437 = vector.extract_strided_slice %294 {offsets = [8, 24], sizes = [8, 8], strides = [1, 1]} : vector<16x96xf32> to vector<8x8xf32>
    %438 = vector.extract_strided_slice %294 {offsets = [8, 56], sizes = [8, 8], strides = [1, 1]} : vector<16x96xf32> to vector<8x8xf32>
    %439 = vector.extract_strided_slice %294 {offsets = [8, 88], sizes = [8, 8], strides = [1, 1]} : vector<16x96xf32> to vector<8x8xf32>
    %cst_177 = arith.constant dense<0.000000e+00> : vector<8x8xf32>
    %440 = tpu.matmul %437, %438, %cst_177 {dimension_numbers = #tpu.dot_dimension_numbers<[1], [1], [0], [0], [0, 0, 1, 0], [], []>} : vector<8x8xf32>, vector<8x8xf32>, vector<8x8xf32> -> vector<8x8xf32>
    %cst_178 = arith.constant 0.353553385 : f32
    %441 = vector.broadcast %cst_178 : f32 to vector<8x8xf32>
    %442 = arith.mulf %440, %441 : vector<8x8xf32>
    %443 = vector.broadcast %376 : vector<1x8xf32> to vector<8x8xf32>
    %444 = arith.addf %442, %443 : vector<8x8xf32>
    %cst_179 = arith.constant dense<0xFF800000> : vector<8xf32>
    %445 = vector.multi_reduction <maximumf>, %444, %cst_179 [1] : vector<8x8xf32> to vector<8xf32>
    %446 = vector.shape_cast %445 : vector<8xf32> to vector<8x1xf32>
    %447 = vector.broadcast %446 : vector<8x1xf32> to vector<8x8xf32>
    %448 = arith.subf %444, %447 : vector<8x8xf32>
    %449 = math.exp %448 : vector<8x8xf32>
    %cst_180 = arith.constant dense<0.000000e+00> : vector<8xf32>
    %450 = vector.multi_reduction <add>, %449, %cst_180 [1] : vector<8x8xf32> to vector<8xf32>
    %451 = vector.shape_cast %450 : vector<8xf32> to vector<8x1xf32>
    %452 = tpu.reciprocal %451 {approx = true} : vector<8x1xf32> -> vector<8x1xf32>
    %453 = vector.broadcast %452 : vector<8x1xf32> to vector<8x8xf32>
    %454 = arith.mulf %449, %453 : vector<8x8xf32>
    %cst_181 = arith.constant dense<0.000000e+00> : vector<8x8xf32>
    %455 = tpu.matmul %454, %439, %cst_181 {dimension_numbers = #tpu.dot_dimension_numbers<[1], [0], [0], [1], [0, 0, 1, 1], [], []>} : vector<8x8xf32>, vector<8x8xf32>, vector<8x8xf32> -> vector<8x8xf32>
    %c8_182 = arith.constant 8 : index
    %c24_183 = arith.constant 24 : index
    %456 = vector.load %arg19[%c8_182, %c24_183] : memref<16x32xf32, #tpu.memory_space<vmem>>, vector<8x8xf32>
    tpu.vector_store %arg19[%c8_182, %c24_183], %455 {strides = array<i32>} : memref<16x32xf32, #tpu.memory_space<vmem>>, vector<8x8xf32>,
    %c0_184 = arith.constant 0 : index
    %c0_185 = arith.constant 0 : index
    %457 = vector.load %arg19[%c0_184, %c0_185] : memref<16x32xf32, #tpu.memory_space<vmem>>, vector<16x32xf32>
    %c1_186 = arith.constant 1 : index
    %c0_187 = arith.constant 0 : index
    %c0_188 = arith.constant 0 : index
    %458 = vector.load %arg6[%c1_186, %c0_187, %c0_188] : memref<2x32x32xf32, #tpu.memory_space<vmem>>, vector<1x32x32xf32>
    %459 = vector.shape_cast %458 : vector<1x32x32xf32> to vector<32x32xf32>
    %cst_189 = arith.constant dense<0.000000e+00> : vector<16x32xf32>
    %460 = tpu.matmul %457, %459, %cst_189 {dimension_numbers = #tpu.dot_dimension_numbers<[1], [0], [0], [1], [0, 0, 1, 1], [], []>} : vector<16x32xf32>, vector<32x32xf32>, vector<16x32xf32> -> vector<16x32xf32>
    %c1_190 = arith.constant 1 : index
    %c0_191 = arith.constant 0 : index
    %c0_192 = arith.constant 0 : index
    %461 = vector.load %arg7[%c1_190, %c0_191, %c0_192] : memref<2x1x32xf32, #tpu.memory_space<vmem>>, vector<1x1x32xf32>
    %462 = vector.shape_cast %461 : vector<1x1x32xf32> to vector<1x32xf32>
    %463 = vector.broadcast %462 : vector<1x32xf32> to vector<16x32xf32>
    %464 = arith.addf %460, %463 : vector<16x32xf32>
    %465 = arith.addf %464, %287 : vector<16x32xf32>
    %c1_193 = arith.constant 1 : index
    %c0_194 = arith.constant 0 : index
    %c0_195 = arith.constant 0 : index
    %466 = vector.load %arg8[%c1_193, %c0_194, %c0_195] : memref<2x1x32xf32, #tpu.memory_space<vmem>>, vector<1x1x32xf32>
    %467 = vector.shape_cast %466 : vector<1x1x32xf32> to vector<1x32xf32>
    %c1_196 = arith.constant 1 : index
    %c0_197 = arith.constant 0 : index
    %c0_198 = arith.constant 0 : index
    %468 = vector.load %arg9[%c1_196, %c0_197, %c0_198] : memref<2x1x32xf32, #tpu.memory_space<vmem>>, vector<1x1x32xf32>
    %469 = vector.shape_cast %468 : vector<1x1x32xf32> to vector<1x32xf32>
    %cst_199 = arith.constant dense<0.000000e+00> : vector<16xf32>
    %470 = vector.multi_reduction <add>, %465, %cst_199 [1] : vector<16x32xf32> to vector<16xf32>
    %471 = vector.shape_cast %470 : vector<16xf32> to vector<16x1xf32>
    %cst_200 = arith.constant 3.200000e+01 : f32
    %472 = vector.broadcast %cst_200 : f32 to vector<16x1xf32>
    %473 = arith.divf %471, %472 : vector<16x1xf32>
    %474 = vector.broadcast %473 : vector<16x1xf32> to vector<16x32xf32>
    %475 = arith.subf %465, %474 : vector<16x32xf32>
    %476 = arith.mulf %475, %475 : vector<16x32xf32>
    %cst_201 = arith.constant dense<0.000000e+00> : vector<16xf32>
    %477 = vector.multi_reduction <add>, %476, %cst_201 [1] : vector<16x32xf32> to vector<16xf32>
    %478 = vector.shape_cast %477 : vector<16xf32> to vector<16x1xf32>
    %cst_202 = arith.constant 3.200000e+01 : f32
    %479 = vector.broadcast %cst_202 : f32 to vector<16x1xf32>
    %480 = arith.divf %478, %479 : vector<16x1xf32>
    %cst_203 = arith.constant 9.99999996E-13 : f32
    %481 = vector.broadcast %cst_203 : f32 to vector<16x1xf32>
    %482 = arith.addf %480, %481 : vector<16x1xf32>
    %483 = math.rsqrt %482 : vector<16x1xf32>
    %484 = vector.broadcast %473 : vector<16x1xf32> to vector<16x32xf32>
    %485 = arith.subf %465, %484 : vector<16x32xf32>
    %486 = vector.broadcast %483 : vector<16x1xf32> to vector<16x32xf32>
    %487 = arith.mulf %485, %486 : vector<16x32xf32>
    %488 = vector.broadcast %467 : vector<1x32xf32> to vector<16x32xf32>
    %489 = arith.mulf %487, %488 : vector<16x32xf32>
    %490 = vector.broadcast %469 : vector<1x32xf32> to vector<16x32xf32>
    %491 = arith.addf %489, %490 : vector<16x32xf32>
    %c1_204 = arith.constant 1 : index
    %c0_205 = arith.constant 0 : index
    %c0_206 = arith.constant 0 : index
    %492 = vector.load %arg10[%c1_204, %c0_205, %c0_206] : memref<2x32x64xf32, #tpu.memory_space<vmem>>, vector<1x32x64xf32>
    %493 = vector.shape_cast %492 : vector<1x32x64xf32> to vector<32x64xf32>
    %cst_207 = arith.constant dense<0.000000e+00> : vector<16x64xf32>
    %494 = tpu.matmul %491, %493, %cst_207 {dimension_numbers = #tpu.dot_dimension_numbers<[1], [0], [0], [1], [0, 0, 1, 1], [], []>} : vector<16x32xf32>, vector<32x64xf32>, vector<16x64xf32> -> vector<16x64xf32>
    %c1_208 = arith.constant 1 : index
    %c0_209 = arith.constant 0 : index
    %c0_210 = arith.constant 0 : index
    %495 = vector.load %arg11[%c1_208, %c0_209, %c0_210] : memref<2x1x64xf32, #tpu.memory_space<vmem>>, vector<1x1x64xf32>
    %496 = vector.shape_cast %495 : vector<1x1x64xf32> to vector<1x64xf32>
    %497 = vector.broadcast %496 : vector<1x64xf32> to vector<16x64xf32>
    %498 = arith.addf %494, %497 : vector<16x64xf32>
    %cst_211 = arith.constant 5.000000e-01 : f32
    %499 = vector.broadcast %cst_211 : f32 to vector<16x64xf32>
    %500 = arith.mulf %499, %498 : vector<16x64xf32>
    %cst_212 = arith.constant 4.471500e-02 : f32
    %501 = vector.broadcast %cst_212 : f32 to vector<16x64xf32>
    %502 = arith.mulf %501, %498 : vector<16x64xf32>
    %503 = arith.mulf %502, %498 : vector<16x64xf32>
    %504 = arith.mulf %503, %498 : vector<16x64xf32>
    %505 = arith.addf %498, %504 : vector<16x64xf32>
    %cst_213 = arith.constant 0.797884583 : f32
    %506 = vector.broadcast %cst_213 : f32 to vector<16x64xf32>
    %507 = arith.mulf %506, %505 : vector<16x64xf32>
    %508 = math.tanh %507 : vector<16x64xf32>
    %cst_214 = arith.constant 1.000000e+00 : f32
    %509 = vector.broadcast %cst_214 : f32 to vector<16x64xf32>
    %510 = arith.addf %509, %508 : vector<16x64xf32>
    %511 = arith.mulf %500, %510 : vector<16x64xf32>
    %c1_215 = arith.constant 1 : index
    %c0_216 = arith.constant 0 : index
    %c0_217 = arith.constant 0 : index
    %512 = vector.load %arg12[%c1_215, %c0_216, %c0_217] : memref<2x64x32xf32, #tpu.memory_space<vmem>>, vector<1x64x32xf32>
    %513 = vector.shape_cast %512 : vector<1x64x32xf32> to vector<64x32xf32>
    %cst_218 = arith.constant dense<0.000000e+00> : vector<16x32xf32>
    %514 = tpu.matmul %511, %513, %cst_218 {dimension_numbers = #tpu.dot_dimension_numbers<[1], [0], [0], [1], [0, 0, 1, 1], [], []>} : vector<16x64xf32>, vector<64x32xf32>, vector<16x32xf32> -> vector<16x32xf32>
    %c1_219 = arith.constant 1 : index
    %c0_220 = arith.constant 0 : index
    %c0_221 = arith.constant 0 : index
    %515 = vector.load %arg13[%c1_219, %c0_220, %c0_221] : memref<2x1x32xf32, #tpu.memory_space<vmem>>, vector<1x1x32xf32>
    %516 = vector.shape_cast %515 : vector<1x1x32xf32> to vector<1x32xf32>
    %517 = vector.broadcast %516 : vector<1x32xf32> to vector<16x32xf32>
    %518 = arith.addf %514, %517 : vector<16x32xf32>
    %519 = arith.addf %518, %491 : vector<16x32xf32>
    %c1_222 = arith.constant 1 : index
    %c0_223 = arith.constant 0 : index
    %c0_224 = arith.constant 0 : index
    %520 = vector.load %arg14[%c1_222, %c0_223, %c0_224] : memref<2x1x32xf32, #tpu.memory_space<vmem>>, vector<1x1x32xf32>
    %521 = vector.shape_cast %520 : vector<1x1x32xf32> to vector<1x32xf32>
    %c1_225 = arith.constant 1 : index
    %c0_226 = arith.constant 0 : index
    %c0_227 = arith.constant 0 : index
    %522 = vector.load %arg15[%c1_225, %c0_226, %c0_227] : memref<2x1x32xf32, #tpu.memory_space<vmem>>, vector<1x1x32xf32>
    %523 = vector.shape_cast %522 : vector<1x1x32xf32> to vector<1x32xf32>
    %cst_228 = arith.constant dense<0.000000e+00> : vector<16xf32>
    %524 = vector.multi_reduction <add>, %519, %cst_228 [1] : vector<16x32xf32> to vector<16xf32>
    %525 = vector.shape_cast %524 : vector<16xf32> to vector<16x1xf32>
    %cst_229 = arith.constant 3.200000e+01 : f32
    %526 = vector.broadcast %cst_229 : f32 to vector<16x1xf32>
    %527 = arith.divf %525, %526 : vector<16x1xf32>
    %528 = vector.broadcast %527 : vector<16x1xf32> to vector<16x32xf32>
    %529 = arith.subf %519, %528 : vector<16x32xf32>
    %530 = arith.mulf %529, %529 : vector<16x32xf32>
    %cst_230 = arith.constant dense<0.000000e+00> : vector<16xf32>
    %531 = vector.multi_reduction <add>, %530, %cst_230 [1] : vector<16x32xf32> to vector<16xf32>
    %532 = vector.shape_cast %531 : vector<16xf32> to vector<16x1xf32>
    %cst_231 = arith.constant 3.200000e+01 : f32
    %533 = vector.broadcast %cst_231 : f32 to vector<16x1xf32>
    %534 = arith.divf %532, %533 : vector<16x1xf32>
    %cst_232 = arith.constant 9.99999996E-13 : f32
    %535 = vector.broadcast %cst_232 : f32 to vector<16x1xf32>
    %536 = arith.addf %534, %535 : vector<16x1xf32>
    %537 = math.rsqrt %536 : vector<16x1xf32>
    %538 = vector.broadcast %527 : vector<16x1xf32> to vector<16x32xf32>
    %539 = arith.subf %519, %538 : vector<16x32xf32>
    %540 = vector.broadcast %537 : vector<16x1xf32> to vector<16x32xf32>
    %541 = arith.mulf %539, %540 : vector<16x32xf32>
    %542 = vector.broadcast %521 : vector<1x32xf32> to vector<16x32xf32>
    %543 = arith.mulf %541, %542 : vector<16x32xf32>
    %544 = vector.broadcast %523 : vector<1x32xf32> to vector<16x32xf32>
    %545 = arith.addf %543, %544 : vector<16x32xf32>
    %c0_233 = arith.constant 0 : index
    %c0_234 = arith.constant 0 : index
    %546 = vector.load %arg16[%c0_233, %c0_234] : memref<32x128xf32, #tpu.memory_space<vmem>>, vector<32x128xf32>
    %cst_235 = arith.constant dense<0.000000e+00> : vector<16x128xf32>
    %547 = tpu.matmul %545, %546, %cst_235 {dimension_numbers = #tpu.dot_dimension_numbers<[1], [0], [0], [1], [0, 0, 1, 1], [], []>} : vector<16x32xf32>, vector<32x128xf32>, vector<16x128xf32> -> vector<16x128xf32>
    %c0_236 = arith.constant 0 : index
    %c0_237 = arith.constant 0 : index
    %548 = vector.load %arg17[%c0_236, %c0_237] : memref<1x128xf32, #tpu.memory_space<vmem>>, vector<1x128xf32>
    %549 = vector.broadcast %548 : vector<1x128xf32> to vector<16x128xf32>
    %550 = arith.addf %547, %549 : vector<16x128xf32>
    %c0_238 = arith.constant 0 : index
    %c0_239 = arith.constant 0 : index
    %551 = vector.load %arg18[%c0_238, %c0_239] : memref<16x128xf32, #tpu.memory_space<vmem>>, vector<16x128xf32>
    tpu.vector_store %arg18[%c0_238, %c0_239], %550 {strides = array<i32>} : memref<16x128xf32, #tpu.memory_space<vmem>>, vector<16x128xf32>,
    return
  }
}

</mosaic_0001>

<bundles_post_ra>
// kernel: model_forward.1
= control target key start
LH: loop header
LB: loop body
LE: loop exit
PB: predicated region body
PF: predicated region fallthrough
CT: control target
= control target key end

     0   :  { %vm66_vm0 = vcmask 261120   ;;  %v4643_v36 = vmov 0.0   ;;  %vm4644_vm1 = vmmov 0   ;;  %s4645_s19 = smov 96   ;;  %s4647_s21 = smov 80   ;;  %vm205_vm2 = vcmask 64512   ;;  %s5392_s1 = inlined_call_operand.vmem [shape: f32[16,32], index: 1, kind: input, shape index: {}]   ;;  %s5393_s4 = inlined_call_operand.vmem [shape: f32[2,32,96], index: 4, kind: input, shape index: {}]   ;;  %s5394_s2 = inlined_call_operand.vmem [shape: f32[1,32], index: 2, kind: input, shape index: {}]   ;;  %s5395_s3 = inlined_call_operand.vmem [shape: f32[1,32], index: 3, kind: input, shape index: {}]   ;;  %s5396_s5 = inlined_call_operand.vmem [shape: f32[2,1,96], index: 5, kind: input, shape index: {}]   ;;  %s5397_s0 = inlined_call_operand.vmem [shape: f32[2,8], index: 0, kind: input, shape index: {}]   ;;  %s5398_s6 = inlined_call_operand.vmem [shape: f32[2,32,32], index: 6, kind: input, shape index: {}]   ;;  %s5399_s7 = inlined_call_operand.vmem [shape: f32[2,1,32], index: 7, kind: input, shape index: {}]   ;;  %s5400_s10 = inlined_call_operand.vmem [shape: f32[2,32,64], index: 10, kind: input, shape index: {}]   ;;  %s5401_s8 = inlined_call_operand.vmem [shape: f32[2,1,32], index: 8, kind: input, shape index: {}]   ;;  %s5402_s9 = inlined_call_operand.vmem [shape: f32[2,1,32], index: 9, kind: input, shape index: {}]   ;;  %s5403_s12 = inlined_call_operand.vmem [shape: f32[2,64,32], index: 12, kind: input, shape index: {}]   ;;  %s5404_s11 = inlined_call_operand.vmem [shape: f32[2,1,64], index: 11, kind: input, shape index: {}]   ;;  %s5405_s13 = inlined_call_operand.vmem [shape: f32[2,1,32], index: 13, kind: input, shape index: {}]   ;;  %s5406_s14 = inlined_call_operand.vmem [shape: f32[2,1,32], index: 14, kind: input, shape index: {}]   ;;  %s5407_s15 = inlined_call_operand.vmem [shape: f32[2,1,32], index: 15, kind: input, shape index: {}]   ;;  %s5408_s16 = inlined_call_operand.vmem [shape: f32[32,128], index: 16, kind: input, shape index: {}]   ;;  %s5409_s17 = inlined_call_operand.vmem [shape: f32[1,128], index: 17, kind: input, shape index: {}]   ;;  %s5410_s18 = inlined_call_operand.vmem [shape: f32[16,128], index: 18, kind: output, shape index: {}]  }
   0x1   :  { %5429 = sst [smem:[#allocation3_spill]] %s5392_s1  ;;  %v3934_v29 = vld [vmem:[%s5395_s3] ss:$0 sm:$0xff]  ;;  %4183 = vmatprep.subr.mxu1 %v4643_v36  ;;  %4185 = vmatprep.mubr.msk.f32.mxu1 %vm4644_vm1, %v4643_v36  ;;  %s5421_s22 = smov 72   ;;  %v281_v45 = vlaneseq  ;;  %vm545_vm3 = vcmask 130112   ;;  %vm718_vm4 = vcmask 195712  }
   0x2   :  { %5430 = sst [smem:[#allocation4_spill]] %s5393_s4  ;;  %s5432_s29 = sld [smem:[#allocation3_spill]]  ;;  %v3935_v37 = vld [vmem:[%s5396_s5] ss:$0 sm:$0xff]  ;;  %vm891_vm5 = vcmask 261312   ;;  %vm1845_vm6 = vcmask 523264  }
   0x3   :  { %5431 = sst [smem:[#allocation5_spill]] %s5394_s2  ;;  %s5433_s20 = sld [smem:[#allocation4_spill]]  ;;  %v59_v46 = vld [vmem:[%s5397_s0] sm:$0x3]  ;;  %v4830_v48 = vshrl.u32 %v281_v45, 7 }
   0x4   :  { %s5434_s28 = sld [smem:[#allocation5_spill]]  ;;  %s4646_s4 = smov 88   ;;  %v60_v47 = vsub.f32 1.0, %v59_v46 }
   0x5   :  { %s4649_s2 = smov 120   ;;  %s4650_s23 = smov 112   ;;  %v283_v50 = vsub.s32 0, %v4830_v48 }
   0x6   :  { %s5423_s24 = smov 104   ;;  %v4832_v49 = vmul.f32 -1e+09, %v60_v47  ;;  %s5419_s27 = smov 64  }
   0x7   :  { %s5413_s0 = smov 56   ;;  %s4656_s30 = smov 8  }
   0x8   :  { %v62_v0 = vld [vmem:[%s5432_s29] sm:$0xff]  ;;  %v63_v1 = vld [vmem:[%s5432_s29 + $0x8] sm:$0xff]  ;;  %v4836_v51 = vrot.slane %v4832_v49, %v283_v50  ;;  %s5417_s29 = smov 48   ;;  %s5427_s3 = smov 16  }
   0x9   :  { %v67_v2 = vsel %vm66_vm0, %v62_v0, 0.0  ;;  %v70_v3 = vsel %vm66_vm0, %v63_v1, 0.0  ;;  %v110_v14 = vld [vmem:[%s5433_s20] sm:$0xff]  ;;  %v111_v15 = vld [vmem:[%s5433_s20 + $0x8] sm:$0xff]  ;;  %v112_v16 = vld [vmem:[%s5433_s20 + $0x10] sm:$0xff]  ;;  %s5425_s1 = smov 24  }
   0xa   :  { %68 = vadd.xlane.f32.xlu0 %v67_v2  ;;  %v4447_v17 = vpack.c.bf16 %v111_v15, %v110_v14  ;;  %v113_v18 = vld [vmem:[%s5433_s20 + $0x18] sm:$0xff]  ;;  %v3933_v27 = vld [vmem:[%s5434_s28] ss:$0 sm:$0xff]  ;;  %s5415_s28 = smov 40  }
   0xb   :  { %v4451_v19 = vpack.c.bf16 %v113_v18, %v112_v16 }
   0xc   :  { %4448 = vmatprep.subr.bf16.mxu0 %v4447_v17 }
   0xd   :  { %4450 = vmatpush3.bf16.msra.mxu0 %v4447_v17  ;;  %v973_v17 = vsub.s32 1, %v4830_v48 }
   0xe   :  { %71 = vadd.xlane.f32.xlu0 %v70_v3  ;;  %4452 = vmatprep.subr.bf16.mxu0 %v4451_v19 }
  0x11   :  { %4454 = vmatpush3.bf16.msra.mxu0 %v4451_v19 }
  0x12   :  { %4203 = vmatprep.subr.mxu0 %v4643_v36 }
  0x97   :  { %v69_v4 = vpop.xlane.xlu0 %68 }
  0x98   :  { %v74_v5 = vmul.f32 0.03125, %v69_v4 }
  0x9a   :  { %v76_v6 = vsub.f32 %v62_v0, %v74_v5 }
  0x9b   :  { %v72_v7 = vpop.xlane.xlu0 %71 }
  0x9c   :  { %v75_v8 = vmul.f32 0.03125, %v72_v7  ;;  %v78_v9 = vmul.f32 %v76_v6, %v76_v6 }
  0x9e   :  { %v77_v10 = vsub.f32 %v63_v1, %v75_v8  ;;  %v80_v11 = vsel %vm66_vm0, %v78_v9, 0.0 }
  0x9f   :  { %81 = vadd.xlane.f32.xlu1 %v80_v11 }
  0xa0   :  { %v79_v12 = vmul.f32 %v77_v10, %v77_v10 }
  0xa2   :  { %v83_v13 = vsel %vm66_vm0, %v79_v12, 0.0 }
  0xa3   :  { %84 = vadd.xlane.f32.xlu1 %v83_v13 }
 0x12c   :  { %v82_v20 = vpop.xlane.xlu1 %81 }
 0x12d   :  { %v86_v21 = vmul.f32 0.03125, %v82_v20 }
 0x12f   :  { %v88_v22 = vadd.f32 1e-12, %v86_v21 }
 0x130   :  { %v85_v23 = vpop.xlane.xlu1 %84 }
 0x131   :  { %4551 = vrsqrt.f32 %v88_v22  ;;  %v87_v24 = vmul.f32 0.03125, %v85_v23  ;;  %v4895_v23 = vrot.slane %v4832_v49, %v973_v17 }
 0x133   :  { %v89_v25 = vadd.f32 1e-12, %v87_v24 }
 0x135   :  { %4553 = vrsqrt.f32 %v89_v25 }
 0x13b   :  { %v4552_v26 = vpop.eup %4551 }
 0x13c   :  { %v92_v28 = vmul.f32 %v4552_v26, %v76_v6 }
 0x13e   :  { %v100_v30 = vmul.f32 %v3933_v27, %v92_v28 }
 0x13f   :  { %v4554_v31 = vpop.eup %4553 }
 0x140   :  { %v93_v32 = vmul.f32 %v4554_v31, %v77_v10  ;;  %v4782_v33 = vadd.f32 %v3934_v29, %v100_v30 }
 0x142   :  { %v101_v34 = vmul.f32 %v3933_v27, %v93_v32  ;;  %4180 = vmatprep.mubr.msk.f32.mxu0 %vm66_vm0, %v4782_v33 }
 0x144   :  { %v4786_v35 = vadd.f32 %v3934_v29, %v101_v34 }
 0x146   :  { %4181 = vmatmul.mubr.msk.f32.vlgmr.msra.gmra.mrb[0].mxu0 %vm66_vm0, %v4786_v35 }
 0x147   :  { %4205 = vmatprep.mubr.msk.f32.mxu0 %vm4644_vm1, %v4643_v36 }
 0x219   :  { %v4182_v38 = vpop.f32.mrb[0].mxu0 }
 0x21a   :  { %v193_v39 = vpop.f32.mrb[1].mxu0  ;;  %v4809_v41 = vadd.f32 %v4182_v38, %v3935_v37 }
 0x21b   :  { %v4799_v40 = vadd.f32 %v3935_v37, %v193_v39 }
 0x21d   :  { %203 = vrot.lane.b32.xlu0 %v4799_v40, %s4645_s19 }
 0x221   :  { %376 = vrot.lane.b32.xlu0 %v4799_v40, %s4646_s4 }
 0x225   :  { %549 = vrot.lane.b32.xlu0 %v4799_v40, %s4647_s21 }
 0x229   :  { %722 = vrot.lane.b32.xlu0 %v4799_v40, %s5421_s22 }
 0x22d   :  { %894 = vrot.lane.b32.xlu0 %v4809_v41, %s4645_s19 }
 0x231   :  { %1064 = vrot.lane.b32.xlu0 %v4809_v41, %s4649_s2 }
 0x235   :  { %1236 = vrot.lane.b32.xlu0 %v4809_v41, %s4650_s23 }
 0x239   :  { %1408 = vrot.lane.b32.xlu0 %v4809_v41, %s5423_s24 }
 0x28f   :  { %v204_v42 = vpop.permute.xlu0 %203 }
 0x290   :  { %4184 = vmatpush3.xpose.msk.msra.mxu1 %vm205_vm2, %v204_v42 }
 0x291   :  { %4188 = vmatprep.subr.mxu1 %v4643_v36 }
 0x293   :  { %4186 = vmatmul.mubr.msk.f32.vlgmr.msra.gmra.mrb[0].mxu1 %vm205_vm2, %v4799_v40  ;;  %v377_v43 = vpop.permute.xlu0 %376 }
 0x294   :  { %4190 = vmatprep.mubr.msk.f32.mxu1 %vm4644_vm1, %v4643_v36 }
 0x297   :  { %v550_v44 = vpop.permute.xlu0 %549 }
 0x298   :  { %4204 = vmatpush3.xpose.msk.msra.mxu0 %vm205_vm2, %v550_v44 }
 0x299   :  { %4213 = vmatprep.subr.mxu0 %v4643_v36 }
 0x29b   :  { %v723_v0 = vpop.permute.xlu0 %722 }
 0x29f   :  { %v895_v3 = vpop.permute.xlu0 %894 }
 0x2a3   :  { %v1065_v6 = vpop.permute.xlu0 %1064 }
 0x2a7   :  { %v1237_v10 = vpop.permute.xlu0 %1236 }
 0x2ab   :  { %v1409_v12 = vpop.permute.xlu0 %1408 }
 0x366   :  { %v276_v52 = vpop.f32.mrb[0].mxu1 }
 0x367   :  { %v280_v53 = vmul.f32 0.35355338, %v276_v52  ;;  %v4187_v54 = vpop.f32.mrb[1].mxu1 }
 0x369   :  { %v285_v55 = vadd.f32 %v4836_v51, %v280_v53 }
 0x36b   :  { %v286_v56 = vsel %vm205_vm2, %v285_v55, -inf }
 0x36c   :  { %287 = vmax.xlane.f32.xlu1 %v286_v56 }
 0x37d   :  { %297 = vrot.lane.b32.xlu1 %v4799_v40, %s5419_s27 }
 0x381   :  { %374 = vrot.lane.b32.xlu1 %v4799_v40, %s4649_s2 }
 0x3f9   :  { %v288_v57 = vpop.xlane.xlu1 %287 }
 0x3fa   :  { %v289_v58 = vsub.f32 %v285_v55, %v288_v57 }
 0x3fc   :  { %v290_v59 = vmul.f32 1.442695, %v289_v58 }
 0x3fd   :  { %v298_v60 = vpop.permute.xlu1 %297 }
 0x3fe   :  { %4555 = vpow2.f32 %v290_v59  ;;  %4189 = vmatpush3.msra.mxu1 %v298_v60 }
 0x3ff   :  { %4193 = vmatprep.subr.mxu1 %v4643_v36 }
 0x401   :  { %v375_v63 = vpop.permute.xlu1 %374 }
 0x408   :  { %v4556_v61 = vpop.eup %4555 }
 0x409   :  { %v292_v62 = vsel %vm205_vm2, %v4556_v61, 0.0 }
 0x40a   :  { %293 = vadd.xlane.f32.xlu1 %v292_v62 }
 0x41b   :  { %547 = vrot.lane.b32.xlu1 %v4799_v40, %s4650_s23 }
 0x41f   :  { %720 = vrot.lane.b32.xlu1 %v4799_v40, %s5423_s24  ;;  %s5436_s24 = smov 72  }
 0x423   :  { %1066 = vrot.lane.b32.xlu1 %v4809_v41, %s4646_s4 }
 0x427   :  { %1238 = vrot.lane.b32.xlu1 %v4809_v41, %s4647_s21 }
 0x42b   :  { %1410 = vrot.lane.b32.xlu1 %v4809_v41, %s5421_s22 }
 0x497   :  { %v294_v1 = vpop.xlane.xlu1 %293 }
 0x498   :  { %4557 = vrcp.f32 %v294_v1 }
 0x49b   :  { %v548_v2 = vpop.permute.xlu1 %547 }
 0x49c   :  { %4206 = vmatmul.mubr.msk.f32.vlgmr.msra.gmra.mrb[2].mxu0 %vm205_vm2, %v548_v2 }
 0x49d   :  { %4214 = vmatpush3.xpose.msk.msra.mxu0 %vm205_vm2, %v723_v0  ;;  %4215 = vmatprep.mubr.msk.f32.mxu0 %vm4644_vm1, %v4643_v36 }
 0x49e   :  { %4223 = vmatprep.subr.mxu0 %v4643_v36 }
 0x49f   :  { %v721_v4 = vpop.permute.xlu1 %720 }
 0x4a0   :  { %4216 = vmatmul.mubr.msk.f32.vlgmr.msra.gmra.mrb[4].mxu0 %vm205_vm2, %v721_v4 }
 0x4a1   :  { %4224 = vmatpush3.xpose.msk.msra.mxu0 %vm205_vm2, %v895_v3  ;;  %4225 = vmatprep.mubr.msk.f32.mxu0 %vm4644_vm1, %v4643_v36 }
 0x4a2   :  { %v4558_v5 = vpop.eup %4557  ;;  %4233 = vmatprep.subr.mxu0 %v4643_v36 }
 0x4a3   :  { %v296_v7 = vmul.f32 %v4558_v5, %v4556_v61  ;;  %v1067_v8 = vpop.permute.xlu1 %1066 }
 0x4a4   :  { %4226 = vmatmul.mubr.msk.f32.vlgmr.msra.gmra.mrb[6].mxu0 %vm205_vm2, %v4809_v41 }
 0x4a5   :  { %4234 = vmatpush3.xpose.msk.msra.mxu0 %vm205_vm2, %v1067_v8  ;;  %4191 = vmatmul.mubr.msk.f32.vlgmr.msra.gmra.mrb[2].mxu1 %vm205_vm2, %v296_v7 }
 0x4a6   :  { %4194 = vmatpush3.xpose.msk.msra.mxu1 %vm205_vm2, %v377_v43  ;;  %4235 = vmatprep.mubr.msk.f32.mxu0 %vm4644_vm1, %v4643_v36 }
 0x4a7   :  { %4243 = vmatprep.subr.mxu0 %v4643_v36  ;;  %v1239_v9 = vpop.permute.xlu1 %1238  ;;  %4195 = vmatprep.mubr.msk.f32.mxu1 %vm4644_vm1, %v4643_v36 }
 0x4a8   :  { %4236 = vmatmul.mubr.msk.f32.vlgmr.msra.gmra.mrb[8].mxu0 %vm205_vm2, %v1065_v6  ;;  %4198 = vmatprep.subr.mxu1 %v4643_v36 }
 0x4a9   :  { %4244 = vmatpush3.xpose.msk.msra.mxu0 %vm205_vm2, %v1239_v9  ;;  %4196 = vmatmul.mubr.msk.f32.vlgmr.msra.gmra.mrb[4].mxu1 %vm205_vm2, %v375_v63 }
 0x4aa   :  { %4245 = vmatprep.mubr.msk.f32.mxu0 %vm4644_vm1, %v4643_v36  ;;  %4253 = vmatprep.subr.mxu0 %v4643_v36 }
 0x4ab   :  { %v1411_v11 = vpop.permute.xlu1 %1410  ;;  %4200 = vmatprep.mubr.msk.f32.mxu1 %vm4644_vm1, %v4643_v36 }
 0x4ac   :  { %4246 = vmatmul.mubr.msk.f32.vlgmr.msra.gmra.mrb[10].mxu0 %vm205_vm2, %v1237_v10 }
 0x4ad   :  { %4254 = vmatpush3.xpose.msk.msra.mxu0 %vm205_vm2, %v1411_v11  ;;  %4255 = vmatprep.mubr.msk.f32.mxu0 %vm4644_vm1, %v4643_v36 }
 0x4b0   :  { %4256 = vmatmul.mubr.msk.f32.vlgmr.msra.gmra.mrb[12].mxu0 %vm205_vm2, %v1409_v12 }
 0x56f   :  { %v621_v13 = vpop.f32.mrb[2].mxu0 }
 0x570   :  { %v625_v14 = vmul.f32 0.35355338, %v621_v13  ;;  %v4207_v15 = vpop.f32.mrb[3].mxu0 }
 0x572   :  { %v626_v16 = vadd.f32 %v625_v14, %v4836_v51 }
 0x573   :  { %v794_v18 = vpop.f32.mrb[4].mxu0 }
 0x574   :  { %v798_v19 = vmul.f32 0.35355338, %v794_v18  ;;  %v4217_v20 = vpop.f32.mrb[5].mxu0  ;;  %v627_v21 = vsel %vm205_vm2, %v626_v16, -inf }
 0x575   :  { %628 = vmax.xlane.f32.xlu0 %v627_v21 }
 0x576   :  { %v799_v22 = vadd.f32 %v798_v19, %v4836_v51 }
 0x577   :  { %v966_v24 = vpop.f32.mrb[6].mxu0 }
 0x578   :  { %v970_v25 = vmul.f32 0.35355338, %v966_v24  ;;  %v369_v26 = vpop.f32.mrb[2].mxu1  ;;  %v4227_v27 = vpop.f32.mrb[7].mxu0  ;;  %v800_v28 = vsel %vm205_vm2, %v799_v22, -inf }
 0x579   :  { %373 = vst.msk [vmem:[#allocation2] sm:$0xff] %vm205_vm2, %v369_v26  ;;  %v4192_v29 = vpop.f32.mrb[3].mxu1  ;;  %801 = vmax.xlane.f32.xlu0 %v800_v28 }
 0x57a   :  { %v975_v30 = vadd.f32 %v4895_v23, %v970_v25 }
 0x57b   :  { %v1138_v31 = vpop.f32.mrb[8].mxu0 }
 0x57c   :  { %v448_v32 = vpop.f32.mrb[4].mxu1  ;;  %v4237_v34 = vpop.f32.mrb[9].mxu0  ;;  %v976_v37 = vsel %vm205_vm2, %v975_v30, -inf  ;;  %v1142_v38 = vmul.f32 0.35355338, %v1138_v31 }
 0x57d   :  { %v452_v39 = vmul.f32 0.35355338, %v448_v32  ;;  %v4197_v42 = vpop.f32.mrb[5].mxu1  ;;  %977 = vmax.xlane.f32.xlu0 %v976_v37 }
 0x57e   :  { %v1143_v48 = vadd.f32 %v1142_v38, %v4895_v23 }
 0x57f   :  { %v1310_v43 = vpop.f32.mrb[10].mxu0  ;;  %v453_v44 = vadd.f32 %v452_v39, %v4836_v51 }
 0x580   :  { %v1314_v45 = vmul.f32 0.35355338, %v1310_v43  ;;  %v4247_v46 = vpop.f32.mrb[11].mxu0  ;;  %v1144_v55 = vsel %vm205_vm2, %v1143_v48, -inf }
 0x581   :  { %v454_v47 = vsel %vm205_vm2, %v453_v44, -inf }
 0x582   :  { %455 = vmax.xlane.f32.xlu1 %v454_v47  ;;  %v1315_v49 = vadd.f32 %v1314_v45, %v4895_v23 }
 0x583   :  { %v1482_v50 = vpop.f32.mrb[12].mxu0 }
 0x584   :  { %v1486_v52 = vmul.f32 0.35355338, %v1482_v50  ;;  %v4257_v53 = vpop.f32.mrb[13].mxu0  ;;  %v1316_v54 = vsel %vm205_vm2, %v1315_v49, -inf }
 0x585   :  { %1317 = vmax.xlane.f32.xlu0 %v1316_v54 }
 0x586   :  { %1145 = vmax.xlane.f32.xlu1 %v1144_v55  ;;  %v1487_v56 = vadd.f32 %v1486_v52, %v4895_v23 }
 0x588   :  { %v1488_v57 = vsel %vm205_vm2, %v1487_v56, -inf }
 0x58a   :  { %1489 = vmax.xlane.f32.xlu1 %v1488_v57 }
 0x602   :  { %v629_v58 = vpop.xlane.xlu0 %628 }
 0x603   :  { %v630_v59 = vsub.f32 %v626_v16, %v629_v58 }
 0x605   :  { %v631_v60 = vmul.f32 1.442695, %v630_v59 }
 0x606   :  { %v802_v61 = vpop.xlane.xlu0 %801 }
 0x607   :  { %4559 = vpow2.f32 %v631_v60  ;;  %v803_v62 = vsub.f32 %v799_v22, %v802_v61 }
 0x609   :  { %v804_v63 = vmul.f32 1.442695, %v803_v62 }
 0x60a   :  { %v978_v0 = vpop.xlane.xlu0 %977 }
 0x60b   :  { %4561 = vpow2.f32 %v804_v63  ;;  %v979_v1 = vsub.f32 %v975_v30, %v978_v0 }
 0x60d   :  { %v980_v2 = vmul.f32 1.442695, %v979_v1 }
 0x60f   :  { %4563 = vpow2.f32 %v980_v2  ;;  %v456_v3 = vpop.xlane.xlu1 %455 }
 0x610   :  { %v457_v12 = vsub.f32 %v453_v44, %v456_v3 }
 0x611   :  { %v4909_v4 = vpop.eup %4559 }
 0x612   :  { %v1318_v5 = vpop.xlane.xlu0 %1317  ;;  %v633_v6 = vsel %vm205_vm2, %v4909_v4, 0.0  ;;  %v458_v18 = vmul.f32 1.442695, %v457_v12 }
 0x613   :  { %v1319_v7 = vsub.f32 %v1315_v49, %v1318_v5  ;;  %634 = vadd.xlane.f32.xlu1 %v633_v6  ;;  %v1146_v8 = vpop.xlane.xlu1 %1145  ;;  %v1583_v5 = vld [vmem:[%s5398_s6 + $0x8] sm:$0xff] }
 0x614   :  { %v1147_v9 = vsub.f32 %v1143_v48, %v1146_v8  ;;  %v1584_v8 = vld [vmem:[%s5398_s6 + $0x10] sm:$0xff] }
 0x615   :  { %v4913_v10 = vpop.eup %4561  ;;  %v1320_v11 = vmul.f32 1.442695, %v1319_v7 }
 0x616   :  { %v1148_v13 = vmul.f32 1.442695, %v1147_v9  ;;  %v806_v14 = vsel %vm205_vm2, %v4913_v10, 0.0  ;;  %v1585_v9 = vld [vmem:[%s5398_s6 + $0x18] sm:$0xff] }
 0x617   :  { %4565 = vpow2.f32 %v1320_v11  ;;  %807 = vadd.xlane.f32.xlu0 %v806_v14  ;;  %v1490_v15 = vpop.xlane.xlu1 %1489  ;;  %v4459_v11 = vpack.c.bf16 %v1585_v9, %v1584_v8  ;;  %v1832_v9 = vld [vmem:[%s5403_s12 + $0x10] sm:$0xff] }
 0x618   :  { %4567 = vpow2.f32 %v1148_v13  ;;  %v1491_v16 = vsub.f32 %v1487_v56, %v1490_v15 }
 0x619   :  { %v4917_v17 = vpop.eup %4563 }
 0x61a   :  { %v1492_v19 = vmul.f32 1.442695, %v1491_v16  ;;  %v982_v20 = vsel %vm205_vm2, %v4917_v17, 0.0 }
 0x61b   :  { %983 = vadd.xlane.f32.xlu1 %v982_v20 }
 0x61c   :  { %4569 = vpow2.f32 %v1492_v19 }
 0x61d   :  { %4571 = vpow2.f32 %v458_v18 }
 0x621   :  { %v4921_v21 = vpop.eup %4565 }
 0x622   :  { %v4923_v22 = vpop.eup %4567  ;;  %v1322_v24 = vsel %vm205_vm2, %v4921_v21, 0.0 }
 0x623   :  { %1323 = vadd.xlane.f32.xlu1 %v1322_v24  ;;  %v1150_v25 = vsel %vm205_vm2, %v4923_v22, 0.0 }
 0x624   :  { %1151 = vadd.xlane.f32.xlu0 %v1150_v25 }
 0x626   :  { %v4929_v26 = vpop.eup %4569 }
 0x627   :  { %v1494_v27 = vsel %vm205_vm2, %v4929_v26, 0.0  ;;  %v4572_v28 = vpop.eup %4571 }
 0x628   :  { %1495 = vadd.xlane.f32.xlu0 %v1494_v27  ;;  %v460_v29 = vsel %vm205_vm2, %v4572_v28, 0.0  ;;  %v3962_v27 = vld [vmem:[%s5399_s7] ss:$0 sm:$0xff] }
 0x62c   :  { %461 = vadd.xlane.f32.xlu0 %v460_v29 }
 0x634   :  { %465 = vrot.lane.b32.xlu1 %v4799_v40, %s5413_s0 }
 0x638   :  { %811 = vrot.lane.b32.xlu1 %v4799_v40, %s5415_s28 }
 0x63c   :  { %987 = vrot.lane.b32.xlu1 %v4809_v41, %s5419_s27  ;;  %s5442_s27 = smov 24  }
 0x640   :  { %1155 = vrot.lane.b32.xlu1 %v4809_v41, %s5413_s0 }
 0x642   :  { %638 = vrot.lane.b32.xlu0 %v4799_v40, %s5417_s29 }
 0x644   :  { %1499 = vrot.lane.b32.xlu1 %v4809_v41, %s5415_s28 }
 0x646   :  { %1327 = vrot.lane.b32.xlu0 %v4809_v41, %s5417_s29 }
 0x6a0   :  { %v635_v30 = vpop.xlane.xlu1 %634 }
 0x6a4   :  { %v808_v32 = vpop.xlane.xlu0 %807 }
 0x6a8   :  { %v984_v31 = vpop.xlane.xlu1 %983 }
 0x6b0   :  { %v1324_v34 = vpop.xlane.xlu1 %1323 }
 0x6b1   :  { %v1152_v37 = vpop.xlane.xlu0 %1151 }
 0x6b4   :  { %v466_v38 = vpop.permute.xlu1 %465 }
 0x6b5   :  { %v1496_v39 = vpop.xlane.xlu0 %1495  ;;  %4199 = vmatpush3.msra.mxu1 %v466_v38 }
 0x6b6   :  { %4208 = vmatprep.subr.mxu1 %v4643_v36 }
 0x6b8   :  { %v812_v45 = vpop.permute.xlu1 %811 }
 0x6b9   :  { %v462_v42 = vpop.xlane.xlu0 %461 }
 0x6ba   :  { %4573 = vrcp.f32 %v462_v42 }
 0x6bb   :  { %4575 = vrcp.f32 %v635_v30 }
 0x6bc   :  { %4577 = vrcp.f32 %v808_v32  ;;  %v988_v49 = vpop.permute.xlu1 %987 }
 0x6bd   :  { %4579 = vrcp.f32 %v984_v31  ;;  %v639_v41 = vpop.permute.xlu0 %638 }
 0x6be   :  { %4581 = vrcp.f32 %v1152_v37 }
 0x6bf   :  { %4583 = vrcp.f32 %v1324_v34 }
 0x6c0   :  { %4585 = vrcp.f32 %v1496_v39  ;;  %v1156_v54 = vpop.permute.xlu1 %1155 }
 0x6c1   :  { %v1328_v57 = vpop.permute.xlu0 %1327 }
 0x6c4   :  { %v4574_v40 = vpop.eup %4573  ;;  %v1500_v60 = vpop.permute.xlu1 %1499 }
 0x6c5   :  { %v464_v43 = vmul.f32 %v4574_v40, %v4572_v28  ;;  %v4576_v44 = vpop.eup %4575 }
 0x6c6   :  { %v637_v46 = vmul.f32 %v4576_v44, %v4909_v4  ;;  %v4578_v47 = vpop.eup %4577  ;;  %v1582_v4 = vld [vmem:[%s5398_s6] sm:$0xff] }
 0x6c7   :  { %4201 = vmatmul.mubr.msk.f32.vlgmr.msra.gmra.mrb[6].mxu1 %vm205_vm2, %v464_v43  ;;  %v810_v48 = vmul.f32 %v4578_v47, %v4913_v10  ;;  %v4580_v50 = vpop.eup %4579  ;;  %v4455_v6 = vpack.c.bf16 %v1583_v5, %v1582_v4 }
 0x6c8   :  { %4209 = vmatpush3.msra.mxu1 %v639_v41  ;;  %4210 = vmatprep.mubr.msk.f32.mxu1 %vm4644_vm1, %v4643_v36  ;;  %v986_v52 = vmul.f32 %v4580_v50, %v4917_v17  ;;  %v4582_v53 = vpop.eup %4581  ;;  %v1722_v50 = vld [vmem:[%s5400_s10 + $0x10] sm:$0xff] }
 0x6c9   :  { %4218 = vmatprep.subr.mxu1 %v4643_v36  ;;  %v1154_v55 = vmul.f32 %v4582_v53, %v4923_v22  ;;  %v4584_v56 = vpop.eup %4583  ;;  %4456 = vmatprep.subr.bf16.mxu0 %v4455_v6 }
 0x6ca   :  { %v1326_v58 = vmul.f32 %v4584_v56, %v4921_v21  ;;  %v4586_v59 = vpop.eup %4585  ;;  %4458 = vmatpush3.bf16.msra.mxu0 %v4455_v6  ;;  %v1830_v6 = vld [vmem:[%s5403_s12] sm:$0xff] }
 0x6cb   :  { %4211 = vmatmul.mubr.msk.f32.vlgmr.msra.gmra.mrb[8].mxu1 %vm205_vm2, %v637_v46  ;;  %v1498_v61 = vmul.f32 %v4586_v59, %v4929_v26  ;;  %4460 = vmatprep.subr.bf16.mxu0 %v4459_v11 }
 0x6cc   :  { %4219 = vmatpush3.msra.mxu1 %v812_v45  ;;  %4220 = vmatprep.mubr.msk.f32.mxu1 %vm4644_vm1, %v4643_v36 }
 0x6cd   :  { %4228 = vmatprep.subr.mxu1 %v4643_v36 }
 0x6ce   :  { %4462 = vmatpush3.bf16.msra.mxu0 %v4459_v11 }
 0x6cf   :  { %4221 = vmatmul.mubr.msk.f32.vlgmr.msra.gmra.mrb[10].mxu1 %vm205_vm2, %v810_v48  ;;  %v1721_v48 = vld [vmem:[%s5400_s10 + $0x8] sm:$0xff] }
 0x6d0   :  { %4229 = vmatpush3.msra.mxu1 %v988_v49  ;;  %4230 = vmatprep.mubr.msk.f32.mxu1 %vm4644_vm1, %v4643_v36 }
 0x6d1   :  { %4238 = vmatprep.subr.mxu1 %v4643_v36 }
 0x6d3   :  { %4231 = vmatmul.mubr.msk.f32.vlgmr.msra.gmra.mrb[12].mxu1 %vm205_vm2, %v986_v52  ;;  %v1723_v52 = vld [vmem:[%s5400_s10 + $0x18] sm:$0xff] }
 0x6d4   :  { %4239 = vmatpush3.msra.mxu1 %v1156_v54  ;;  %4240 = vmatprep.mubr.msk.f32.mxu1 %vm4644_vm1, %v4643_v36  ;;  %v4467_v53 = vpack.c.bf16 %v1723_v52, %v1722_v50 }
 0x6d5   :  { %4248 = vmatprep.subr.mxu1 %v4643_v36 }
 0x6d7   :  { %4241 = vmatmul.mubr.msk.f32.vlgmr.msra.gmra.mrb[14].mxu1 %vm205_vm2, %v1154_v55 }
 0x6d8   :  { %4249 = vmatpush3.msra.mxu1 %v1328_v57  ;;  %4250 = vmatprep.mubr.msk.f32.mxu1 %vm4644_vm1, %v4643_v36 }
 0x6d9   :  { %4258 = vmatprep.subr.mxu1 %v4643_v36 }
 0x6db   :  { %4251 = vmatmul.mubr.msk.f32.vlgmr.msra.gmra.mrb[16].mxu1 %vm205_vm2, %v1326_v58 }
 0x6dc   :  { %4259 = vmatpush3.msra.mxu1 %v1500_v60  ;;  %4260 = vmatprep.mubr.msk.f32.mxu1 %vm4644_vm1, %v4643_v36 }
 0x6df   :  { %4261 = vmatmul.mubr.msk.f32.vlgmr.msra.gmra.mrb[18].mxu1 %vm205_vm2, %v1498_v61  ;;  %v3965_v61 = vld [vmem:[%s5401_s8] ss:$0 sm:$0xff] }
 0x79a   :  { %v537_v62 = vpop.f32.mrb[6].mxu1 }
 0x79b   :  { %542 = vrot.lane.b32.xlu0 %v537_v62, %s4656_s30  ;;  %v4202_v63 = vpop.f32.mrb[7].mxu1 }
 0x79c   :  { %v3966_v63 = vld [vmem:[%s5402_s9] ss:$0 sm:$0xff] }
 0x79e   :  { %v710_v0 = vpop.f32.mrb[8].mxu1 }
 0x79f   :  { %715 = vrot.lane.b32.xlu1 %v710_v0, %s5427_s3  ;;  %v4212_v1 = vpop.f32.mrb[9].mxu1 }
 0x7a2   :  { %v883_v2 = vpop.f32.mrb[10].mxu1 }
 0x7a3   :  { %888 = vrot.lane.b32.xlu1 %v883_v2, %s5425_s1  ;;  %v4222_v3 = vpop.f32.mrb[11].mxu1 }
 0x7a6   :  { %v1059_v7 = vpop.f32.mrb[12].mxu1 }
 0x7a7   :  { %1063 = vst.msk [vmem:[#allocation2 + $0x8] sm:$0xff] %vm205_vm2, %v1059_v7  ;;  %v4232_v10 = vpop.f32.mrb[13].mxu1  ;;  %v1831_v7 = vld [vmem:[%s5403_s12 + $0x8] sm:$0xff] }
 0x7a8   :  { %v4471_v8 = vpack.c.bf16 %v1831_v7, %v1830_v6  ;;  %v1833_v10 = vld [vmem:[%s5403_s12 + $0x18] sm:$0xff] }
 0x7a9   :  { %v4475_v11 = vpack.c.bf16 %v1833_v10, %v1832_v9 }
 0x7aa   :  { %v1227_v12 = vpop.f32.mrb[14].mxu1  ;;  %4472 = vmatprep.subr.bf16.mxu0 %v4471_v8 }
 0x7ab   :  { %1232 = vrot.lane.b32.xlu0 %v1227_v12, %s4656_s30  ;;  %v4242_v13 = vpop.f32.mrb[15].mxu1  ;;  %v1834_v12 = vld [vmem:[%s5403_s12 + $0x20] sm:$0xff] }
 0x7ac   :  { %v1835_v13 = vld [vmem:[%s5403_s12 + $0x28] sm:$0xff] }
 0x7ae   :  { %v1399_v14 = vpop.f32.mrb[16].mxu1 }
 0x7af   :  { %1404 = vrot.lane.b32.xlu0 %v1399_v14, %s5427_s3  ;;  %v4252_v15 = vpop.f32.mrb[17].mxu1  ;;  %v4479_v14 = vpack.c.bf16 %v1835_v13, %v1834_v12  ;;  %v3973_v12 = vld [vmem:[%s5406_s14] ss:$0 sm:$0xff] }
 0x7b0   :  { %v1836_v15 = vld [vmem:[%s5403_s12 + $0x30] sm:$0xff] }
 0x7b2   :  { %v1571_v16 = vpop.f32.mrb[18].mxu1 }
 0x7b3   :  { %1576 = vrot.lane.b32.xlu1 %v1571_v16, %s5425_s1  ;;  %v4262_v17 = vpop.f32.mrb[19].mxu1  ;;  %v1837_v16 = vld [vmem:[%s5403_s12 + $0x38] sm:$0xff] }
 0x7b4   :  { %v4483_v17 = vpack.c.bf16 %v1837_v16, %v1836_v15  ;;  %v3974_v16 = vld [vmem:[%s5407_s15] ss:$0 sm:$0xff] }
 0x80d   :  { %v543_v18 = vpop.permute.xlu0 %542 }
 0x80e   :  { %546 = vst.msk [vmem:[#allocation2] sm:$0xff] %vm545_vm3, %v543_v18  ;;  %v3967_v18 = vld [vmem:[%s5404_s11] ss:$0 sm:$0xff] }
 0x811   :  { %v716_v19 = vpop.permute.xlu1 %715 }
 0x812   :  { %719 = vst.msk [vmem:[#allocation2] sm:$0xff] %vm718_vm4, %v716_v19 }
 0x815   :  { %v889_v20 = vpop.permute.xlu1 %888 }
 0x816   :  { %892 = vst.msk [vmem:[#allocation2] sm:$0xff] %vm891_vm5, %v889_v20 }
 0x81d   :  { %v1233_v21 = vpop.permute.xlu0 %1232  ;;  %v1580_v22 = vld [vmem:[#allocation2] sm:$0xff] }
 0x81e   :  { %1235 = vst.msk [vmem:[#allocation2 + $0x8] sm:$0xff] %vm545_vm3, %v1233_v21  ;;  %4271 = vmatprep.mubr.msk.f32.mxu0 %vm66_vm0, %v1580_v22 }
 0x821   :  { %v1405_v24 = vpop.permute.xlu0 %1404 }
 0x822   :  { %1407 = vst.msk [vmem:[#allocation2 + $0x8] sm:$0xff] %vm718_vm4, %v1405_v24 }
 0x825   :  { %v1577_v25 = vpop.permute.xlu1 %1576 }
 0x826   :  { %1579 = vst.msk [vmem:[#allocation2 + $0x8] sm:$0xff] %vm891_vm5, %v1577_v25 }
 0x82d   :  { %v1581_v26 = vld [vmem:[#allocation2 + $0x8] sm:$0xff] }
 0x82e   :  { %4272 = vmatmul.mubr.msk.f32.vlgmr.msra.gmra.mrb[14].mxu0 %vm66_vm0, %v1581_v26 }
 0x82f   :  { %4474 = vmatpush3.bf16.msra.mxu0 %v4471_v8 }
 0x830   :  { %4476 = vmatprep.subr.bf16.mxu0 %v4475_v11 }
 0x833   :  { %4478 = vmatpush3.bf16.msra.mxu0 %v4475_v11 }
 0x834   :  { %4480 = vmatprep.subr.bf16.mxu0 %v4479_v14 }
 0x837   :  { %4482 = vmatpush3.bf16.msra.mxu0 %v4479_v14 }
 0x838   :  { %4484 = vmatprep.subr.bf16.mxu0 %v4483_v17 }
 0x83b   :  { %4486 = vmatpush3.bf16.msra.mxu0 %v4483_v17 }
 0x83c   :  { %4325 = vmatprep.subr.mxu0 %v4643_v36 }
 0x901   :  { %v4273_v28 = vpop.f32.mrb[14].mxu0 }
 0x902   :  { %v1671_v29 = vadd.f32 %v4273_v28, %v3962_v27  ;;  %v1665_v30 = vpop.f32.mrb[15].mxu0 }
 0x903   :  { %v1666_v31 = vadd.f32 %v3962_v27, %v1665_v30 }
 0x904   :  { %v1675_v32 = vadd.f32 %v1671_v29, %v4786_v35 }
 0x905   :  { %v1674_v34 = vadd.f32 %v1666_v31, %v4782_v33  ;;  %v1720_v33 = vld [vmem:[%s5400_s10] sm:$0xff] }
 0x906   :  { %v1681_v37 = vsel %vm66_vm0, %v1675_v32, 0.0  ;;  %v4463_v49 = vpack.c.bf16 %v1721_v48, %v1720_v33 }
 0x907   :  { %1682 = vadd.xlane.f32.xlu1 %v1681_v37  ;;  %v1678_v38 = vsel %vm66_vm0, %v1674_v34, 0.0 }
 0x908   :  { %1679 = vadd.xlane.f32.xlu0 %v1678_v38  ;;  %4464 = vmatprep.subr.bf16.mxu1 %v4463_v49 }
 0x909   :  { %4466 = vmatpush3.bf16.msra.mxu1 %v4463_v49 }
 0x90a   :  { %4468 = vmatprep.subr.bf16.mxu1 %v4467_v53 }
 0x90d   :  { %4470 = vmatpush3.bf16.msra.mxu1 %v4467_v53 }
 0x994   :  { %v1683_v39 = vpop.xlane.xlu1 %1682 }
 0x995   :  { %v1685_v42 = vmul.f32 0.03125, %v1683_v39  ;;  %v1680_v40 = vpop.xlane.xlu0 %1679 }
 0x996   :  { %v1684_v43 = vmul.f32 0.03125, %v1680_v40 }
 0x997   :  { %v1687_v44 = vsub.f32 %v1675_v32, %v1685_v42 }
 0x998   :  { %v1686_v45 = vsub.f32 %v1674_v34, %v1684_v43 }
 0x999   :  { %v1689_v47 = vmul.f32 %v1687_v44, %v1687_v44 }
 0x99a   :  { %v1688_v41 = vmul.f32 %v1686_v45, %v1686_v45 }
 0x99b   :  { %v1693_v35 = vsel %vm66_vm0, %v1689_v47, 0.0 }
 0x99c   :  { %v1690_v46 = vsel %vm66_vm0, %v1688_v41, 0.0  ;;  %v3970_v41 = vld [vmem:[%s5405_s13] ss:$0 sm:$0xff] }
 0x99d   :  { %1691 = vadd.xlane.f32.xlu0 %v1690_v46 }
 0x9a1   :  { %1694 = vadd.xlane.f32.xlu0 %v1693_v35 }
 0xa2a   :  { %v1692_v54 = vpop.xlane.xlu0 %1691 }
 0xa2b   :  { %v1696_v55 = vmul.f32 0.03125, %v1692_v54 }
 0xa2d   :  { %v1698_v56 = vadd.f32 1e-12, %v1696_v55 }
 0xa2e   :  { %v1695_v57 = vpop.xlane.xlu0 %1694 }
 0xa2f   :  { %4587 = vrsqrt.f32 %v1698_v56  ;;  %v1697_v58 = vmul.f32 0.03125, %v1695_v57 }
 0xa31   :  { %v1699_v59 = vadd.f32 1e-12, %v1697_v58 }
 0xa33   :  { %4589 = vrsqrt.f32 %v1699_v59 }
 0xa39   :  { %v4588_v60 = vpop.eup %4587 }
 0xa3a   :  { %v1702_v62 = vmul.f32 %v4588_v60, %v1686_v45 }
 0xa3c   :  { %v1710_v0 = vmul.f32 %v3965_v61, %v1702_v62 }
 0xa3d   :  { %v4590_v1 = vpop.eup %4589 }
 0xa3e   :  { %v1703_v2 = vmul.f32 %v4590_v1, %v1687_v44  ;;  %v5033_v3 = vadd.f32 %v3966_v63, %v1710_v0  ;;  %v3976_v0 = vld [vmem:[%s5433_s20 + $0x28] sm:$0xff] }
 0xa40   :  { %v1711_v4 = vmul.f32 %v3965_v61, %v1703_v2  ;;  %4282 = vmatprep.mubr.msk.f32.mxu1 %vm66_vm0, %v5033_v3  ;;  %v3977_v2 = vld [vmem:[%s5433_s20 + $0x30] sm:$0xff] }
 0xa42   :  { %v1719_v5 = vadd.f32 %v3966_v63, %v1711_v4  ;;  %v3975_v63 = vld [vmem:[%s5433_s20 + $0x20] sm:$0xff] }
 0xa43   :  { %v4487_v1 = vpack.c.bf16 %v3976_v0, %v3975_v63 }
 0xa44   :  { %4283 = vmatmul.mubr.msk.f32.vlgmr.msra.gmra.mrb[20].mxu1 %vm66_vm0, %v1719_v5 }
 0xa45   :  { %4488 = vmatprep.subr.bf16.mxu1 %v4487_v1 }
 0xa46   :  { %4490 = vmatpush3.bf16.msra.mxu1 %v4487_v1 }
 0xb17   :  { %v4284_v19 = vpop.f32.mrb[20].mxu1 }
 0xb18   :  { %v1809_v20 = vadd.f32 %v4284_v19, %v3967_v18  ;;  %v1803_v21 = vpop.f32.mrb[21].mxu1 }
 0xb19   :  { %v1804_v22 = vadd.f32 %v3967_v18, %v1803_v21  ;;  %v3980_v21 = vld [vmem:[%s5396_s5 + $0x1] ss:$0 sm:$0xff]  ;;  %s5435_s5 = smov 104  }
 0xb1a   :  { %v1815_v24 = vmul.f32 0.044715, %v1809_v20  ;;  %v1813_v43 = vmul.f32 0.5, %v1809_v20 }
 0xb1b   :  { %v1814_v25 = vmul.f32 0.044715, %v1804_v22  ;;  %v1812_v42 = vmul.f32 0.5, %v1804_v22 }
 0xb1c   :  { %v1817_v26 = vmul.f32 %v1815_v24, %v1809_v20 }
 0xb1d   :  { %v1816_v27 = vmul.f32 %v1814_v25, %v1804_v22 }
 0xb1e   :  { %v1819_v28 = vmul.f32 %v1817_v26, %v1809_v20 }
 0xb1f   :  { %v1818_v29 = vmul.f32 %v1816_v27, %v1804_v22 }
 0xb20   :  { %v1821_v30 = vadd.f32 %v1819_v28, %v1809_v20 }
 0xb21   :  { %v1820_v31 = vadd.f32 %v1818_v29, %v1804_v22 }
 0xb22   :  { %v1823_v32 = vmul.f32 0.7978846, %v1821_v30 }
 0xb23   :  { %v1822_v34 = vmul.f32 0.7978846, %v1820_v31 }
 0xb24   :  { %4591 = vtanh.f32 %v1823_v32 }
 0xb25   :  { %4593 = vtanh.f32 %v1822_v34 }
 0xb2e   :  { %v4592_v37 = vpop.eup %4591 }
 0xb2f   :  { %v4594_v38 = vpop.eup %4593  ;;  %v1827_v39 = vadd.f32 1.0, %v4592_v37 }
 0xb30   :  { %v1826_v40 = vadd.f32 1.0, %v4594_v38 }
 0xb31   :  { %v1829_v45 = vmul.f32 %v1827_v39, %v1813_v43 }
 0xb32   :  { %v1828_v44 = vmul.f32 %v1826_v40, %v1812_v42 }
 0xb34   :  { %4301 = vmatprep.mubr.msk.f32.mxu0 %vm1845_vm6, %v1828_v44 }
 0xb35   :  { %4302 = vmatmul.mubr.msk.f32.vlgmr.msra.gmra.mrb[16].mxu0 %vm1845_vm6, %v1829_v45 }
 0xb36   :  { %4327 = vmatprep.mubr.msk.f32.mxu0 %vm4644_vm1, %v4643_v36 }
 0xc08   :  { %v4303_v46 = vpop.f32.mrb[16].mxu0 }
 0xc09   :  { %v1924_v47 = vadd.f32 %v4303_v46, %v3970_v41  ;;  %v1918_v35 = vpop.f32.mrb[17].mxu0 }
 0xc0a   :  { %v1919_v33 = vadd.f32 %v3970_v41, %v1918_v35 }
 0xc0b   :  { %v1928_v48 = vadd.f32 %v1924_v47, %v1719_v5 }
 0xc0c   :  { %v1927_v49 = vadd.f32 %v1919_v33, %v5033_v3  ;;  %v3978_v3 = vld [vmem:[%s5433_s20 + $0x38] sm:$0xff] }
 0xc0d   :  { %v1934_v50 = vsel %vm66_vm0, %v1928_v48, 0.0  ;;  %v4491_v4 = vpack.c.bf16 %v3978_v3, %v3977_v2 }
 0xc0e   :  { %1935 = vadd.xlane.f32.xlu1 %v1934_v50  ;;  %v1931_v52 = vsel %vm66_vm0, %v1927_v49, 0.0 }
 0xc0f   :  { %1932 = vadd.xlane.f32.xlu0 %v1931_v52  ;;  %4492 = vmatprep.subr.bf16.mxu1 %v4491_v4 }
 0xc10   :  { %4494 = vmatpush3.bf16.msra.mxu1 %v4491_v4 }
 0xc11   :  { %4315 = vmatprep.subr.mxu1 %v4643_v36 }
 0xc9b   :  { %v1936_v53 = vpop.xlane.xlu1 %1935 }
 0xc9c   :  { %v1938_v54 = vmul.f32 0.03125, %v1936_v53  ;;  %v1933_v55 = vpop.xlane.xlu0 %1932 }
 0xc9d   :  { %v1937_v56 = vmul.f32 0.03125, %v1933_v55 }
 0xc9e   :  { %v1940_v57 = vsub.f32 %v1928_v48, %v1938_v54 }
 0xc9f   :  { %v1939_v58 = vsub.f32 %v1927_v49, %v1937_v56 }
 0xca0   :  { %v1942_v59 = vmul.f32 %v1940_v57, %v1940_v57 }
 0xca1   :  { %v1941_v60 = vmul.f32 %v1939_v58, %v1939_v58 }
 0xca2   :  { %v1946_v61 = vsel %vm66_vm0, %v1942_v59, 0.0 }
 0xca3   :  { %1947 = vadd.xlane.f32.xlu1 %v1946_v61  ;;  %v1943_v62 = vsel %vm66_vm0, %v1941_v60, 0.0 }
 0xca4   :  { %1944 = vadd.xlane.f32.xlu0 %v1943_v62 }
 0xd30   :  { %v1948_v5 = vpop.xlane.xlu1 %1947 }
 0xd31   :  { %v1950_v6 = vmul.f32 0.03125, %v1948_v5  ;;  %v1945_v7 = vpop.xlane.xlu0 %1944 }
 0xd32   :  { %v1949_v8 = vmul.f32 0.03125, %v1945_v7 }
 0xd33   :  { %v1952_v9 = vadd.f32 1e-12, %v1950_v6 }
 0xd34   :  { %v1951_v10 = vadd.f32 1e-12, %v1949_v8 }
 0xd35   :  { %4595 = vrsqrt.f32 %v1952_v9 }
 0xd36   :  { %4597 = vrsqrt.f32 %v1951_v10 }
 0xd3f   :  { %v4596_v11 = vpop.eup %4595 }
 0xd40   :  { %v4598_v13 = vpop.eup %4597  ;;  %v1956_v14 = vmul.f32 %v4596_v11, %v1940_v57 }
 0xd41   :  { %v1955_v15 = vmul.f32 %v4598_v13, %v1939_v58 }
 0xd42   :  { %v1964_v17 = vmul.f32 %v3973_v12, %v1956_v14 }
 0xd43   :  { %v1963_v18 = vmul.f32 %v3973_v12, %v1955_v15 }
 0xd44   :  { %v5099_v20 = vadd.f32 %v3974_v16, %v1964_v17 }
 0xd45   :  { %v5097_v19 = vadd.f32 %v3974_v16, %v1963_v18 }
 0xd47   :  { %4312 = vmatprep.mubr.msk.f32.mxu1 %vm66_vm0, %v5097_v19 }
 0xd48   :  { %4313 = vmatmul.mubr.msk.f32.vlgmr.msra.gmra.mrb[22].mxu1 %vm66_vm0, %v5099_v20 }
 0xd49   :  { %4317 = vmatprep.mubr.msk.f32.mxu1 %vm4644_vm1, %v4643_v36 }
 0xe1b   :  { %v4314_v22 = vpop.f32.mrb[22].mxu1 }
 0xe1c   :  { %v2058_v24 = vpop.f32.mrb[23].mxu1  ;;  %v5124_v26 = vadd.f32 %v4314_v22, %v3980_v21 }
 0xe1d   :  { %v5110_v25 = vadd.f32 %v3980_v21, %v2058_v24 }
 0xe1f   :  { %2236 = vrot.lane.b32.xlu1 %v5110_v25, %s4646_s4  ;;  %2068 = vrot.lane.b32.xlu0 %v5110_v25, %s4645_s19 }
 0xe23   :  { %2234 = vrot.lane.b32.xlu1 %v5110_v25, %s4649_s2  ;;  %2406 = vrot.lane.b32.xlu0 %v5110_v25, %s4650_s23 }
 0xe27   :  { %2408 = vrot.lane.b32.xlu1 %v5110_v25, %s4647_s21  ;;  %2578 = vrot.lane.b32.xlu0 %v5110_v25, %s5435_s5 }
 0xe2b   :  { %2580 = vrot.lane.b32.xlu1 %v5110_v25, %s5436_s24  ;;  %2919 = vrot.lane.b32.xlu0 %v5124_v26, %s4646_s4  ;;  %s5438_s4 = smov 48  }
 0xe2f   :  { %2751 = vrot.lane.b32.xlu1 %v5124_v26, %s4645_s19  ;;  %3091 = vrot.lane.b32.xlu0 %v5124_v26, %s4647_s21  ;;  %s5437_s19 = smov 64   ;;  %s5439_s21 = smov 40  }
 0xe33   :  { %2917 = vrot.lane.b32.xlu1 %v5124_v26, %s4649_s2  ;;  %3263 = vrot.lane.b32.xlu0 %v5124_v26, %s5436_s24  ;;  %s5440_s2 = smov 56  }
 0xe37   :  { %3089 = vrot.lane.b32.xlu1 %v5124_v26, %s4650_s23  ;;  %s5441_s23 = smov 16  }
 0xe3b   :  { %3261 = vrot.lane.b32.xlu1 %v5124_v26, %s5435_s5 }
 0xe91   :  { %v2237_v27 = vpop.permute.xlu1 %2236  ;;  %v2069_v28 = vpop.permute.xlu0 %2068 }
 0xe92   :  { %4316 = vmatpush3.xpose.msk.msra.mxu1 %vm205_vm2, %v2069_v28  ;;  %4326 = vmatpush3.xpose.msk.msra.mxu0 %vm205_vm2, %v2237_v27 }
 0xe93   :  { %4335 = vmatprep.subr.mxu0 %v4643_v36  ;;  %4320 = vmatprep.subr.mxu1 %v4643_v36 }
 0xe95   :  { %v2235_v29 = vpop.permute.xlu1 %2234  ;;  %4318 = vmatmul.mubr.msk.f32.vlgmr.msra.gmra.mrb[24].mxu1 %vm205_vm2, %v5110_v25  ;;  %v2407_v30 = vpop.permute.xlu0 %2406 }
 0xe96   :  { %4328 = vmatmul.mubr.msk.f32.vlgmr.msra.gmra.mrb[18].mxu0 %vm205_vm2, %v2235_v29  ;;  %4322 = vmatprep.mubr.msk.f32.mxu1 %vm4644_vm1, %v4643_v36 }
 0xe97   :  { %4337 = vmatprep.mubr.msk.f32.mxu0 %vm4644_vm1, %v4643_v36 }
 0xe99   :  { %v2409_v31 = vpop.permute.xlu1 %2408  ;;  %v2579_v32 = vpop.permute.xlu0 %2578 }
 0xe9a   :  { %4336 = vmatpush3.xpose.msk.msra.mxu0 %vm205_vm2, %v2409_v31 }
 0xe9b   :  { %4345 = vmatprep.subr.mxu0 %v4643_v36 }
 0xe9d   :  { %v2581_v34 = vpop.permute.xlu1 %2580  ;;  %4338 = vmatmul.mubr.msk.f32.vlgmr.msra.gmra.mrb[20].mxu0 %vm205_vm2, %v2407_v30  ;;  %v2920_v37 = vpop.permute.xlu0 %2919 }
 0xe9e   :  { %4346 = vmatpush3.xpose.msk.msra.mxu0 %vm205_vm2, %v2581_v34  ;;  %4347 = vmatprep.mubr.msk.f32.mxu0 %vm4644_vm1, %v4643_v36 }
 0xe9f   :  { %4355 = vmatprep.subr.mxu0 %v4643_v36 }
 0xea1   :  { %v2752_v38 = vpop.permute.xlu1 %2751  ;;  %4348 = vmatmul.mubr.msk.f32.vlgmr.msra.gmra.mrb[22].mxu0 %vm205_vm2, %v2579_v32  ;;  %v3092_v42 = vpop.permute.xlu0 %3091 }
 0xea2   :  { %4356 = vmatpush3.xpose.msk.msra.mxu0 %vm205_vm2, %v2752_v38  ;;  %4357 = vmatprep.mubr.msk.f32.mxu0 %vm4644_vm1, %v4643_v36 }
 0xea3   :  { %4365 = vmatprep.subr.mxu0 %v4643_v36 }
 0xea5   :  { %v2918_v39 = vpop.permute.xlu1 %2917  ;;  %4358 = vmatmul.mubr.msk.f32.vlgmr.msra.gmra.mrb[24].mxu0 %vm205_vm2, %v5124_v26  ;;  %v3264_v43 = vpop.permute.xlu0 %3263 }
 0xea6   :  { %4366 = vmatpush3.xpose.msk.msra.mxu0 %vm205_vm2, %v2920_v37  ;;  %4367 = vmatprep.mubr.msk.f32.mxu0 %vm4644_vm1, %v4643_v36 }
 0xea7   :  { %4375 = vmatprep.subr.mxu0 %v4643_v36 }
 0xea9   :  { %4368 = vmatmul.mubr.msk.f32.vlgmr.msra.gmra.mrb[26].mxu0 %vm205_vm2, %v2918_v39  ;;  %v3090_v40 = vpop.permute.xlu1 %3089 }
 0xeaa   :  { %4376 = vmatpush3.xpose.msk.msra.mxu0 %vm205_vm2, %v3092_v42  ;;  %4377 = vmatprep.mubr.msk.f32.mxu0 %vm4644_vm1, %v4643_v36 }
 0xeab   :  { %4385 = vmatprep.subr.mxu0 %v4643_v36 }
 0xead   :  { %4378 = vmatmul.mubr.msk.f32.vlgmr.msra.gmra.mrb[28].mxu0 %vm205_vm2, %v3090_v40  ;;  %v3262_v44 = vpop.permute.xlu1 %3261 }
 0xeae   :  { %4386 = vmatpush3.xpose.msk.msra.mxu0 %vm205_vm2, %v3264_v43  ;;  %4387 = vmatprep.mubr.msk.f32.mxu0 %vm4644_vm1, %v4643_v36 }
 0xeb1   :  { %4388 = vmatmul.mubr.msk.f32.vlgmr.msra.gmra.mrb[30].mxu0 %vm205_vm2, %v3262_v44 }
 0xf68   :  { %v2140_v45 = vpop.f32.mrb[24].mxu1 }
 0xf69   :  { %v2144_v41 = vmul.f32 0.35355338, %v2140_v45  ;;  %v4319_v46 = vpop.f32.mrb[25].mxu1  ;;  %v2308_v47 = vpop.f32.mrb[18].mxu0 }
 0xf6a   :  { %v2312_v35 = vmul.f32 0.35355338, %v2308_v47  ;;  %v4329_v33 = vpop.f32.mrb[19].mxu0 }
 0xf6b   :  { %v2145_v48 = vadd.f32 %v2144_v41, %v4836_v51 }
 0xf6c   :  { %v2313_v49 = vadd.f32 %v2312_v35, %v4836_v51 }
 0xf6d   :  { %v2146_v50 = vsel %vm205_vm2, %v2145_v48, -inf }
 0xf6e   :  { %2147 = vmax.xlane.f32.xlu0 %v2146_v50  ;;  %v2314_v52 = vsel %vm205_vm2, %v2313_v49, -inf }
 0xf6f   :  { %2315 = vmax.xlane.f32.xlu1 %v2314_v52 }
 0xf70   :  { %v2480_v53 = vpop.f32.mrb[20].mxu0 }
 0xf71   :  { %v2484_v54 = vmul.f32 0.35355338, %v2480_v53  ;;  %v4339_v55 = vpop.f32.mrb[21].mxu0 }
 0xf73   :  { %v5186_v56 = vadd.f32 %v2484_v54, %v4836_v51 }
 0xf74   :  { %v2652_v57 = vpop.f32.mrb[22].mxu0 }
 0xf75   :  { %v2656_v58 = vmul.f32 0.35355338, %v2652_v57  ;;  %v4349_v59 = vpop.f32.mrb[23].mxu0  ;;  %v2486_v60 = vsel %vm205_vm2, %v5186_v56, -inf }
 0xf76   :  { %2487 = vmax.xlane.f32.xlu0 %v2486_v60 }
 0xf77   :  { %v2657_v61 = vadd.f32 %v2656_v58, %v4836_v51 }
 0xf78   :  { %v2823_v62 = vpop.f32.mrb[24].mxu0 }
 0xf79   :  { %v2827_v63 = vmul.f32 0.35355338, %v2823_v62  ;;  %v4359_v0 = vpop.f32.mrb[25].mxu0  ;;  %v2658_v1 = vsel %vm205_vm2, %v2657_v61, -inf }
 0xf7a   :  { %2659 = vmax.xlane.f32.xlu0 %v2658_v1 }
 0xf7b   :  { %v2828_v2 = vadd.f32 %v2827_v63, %v4895_v23 }
 0xf7c   :  { %v2991_v3 = vpop.f32.mrb[26].mxu0 }
 0xf7d   :  { %v2995_v4 = vmul.f32 0.35355338, %v2991_v3  ;;  %v4369_v5 = vpop.f32.mrb[27].mxu0  ;;  %v2829_v6 = vsel %vm205_vm2, %v2828_v2, -inf }
 0xf7e   :  { %2830 = vmax.xlane.f32.xlu0 %v2829_v6 }
 0xf7f   :  { %v2996_v7 = vadd.f32 %v2995_v4, %v4895_v23 }
 0xf80   :  { %v3163_v8 = vpop.f32.mrb[28].mxu0 }
 0xf81   :  { %v3167_v9 = vmul.f32 0.35355338, %v3163_v8  ;;  %v4379_v10 = vpop.f32.mrb[29].mxu0  ;;  %v2997_v51 = vsel %vm205_vm2, %v2996_v7, -inf }
 0xf82   :  { %2998 = vmax.xlane.f32.xlu1 %v2997_v51 }
 0xf83   :  { %v3168_v11 = vadd.f32 %v3167_v9, %v4895_v23 }
 0xf84   :  { %v3335_v12 = vpop.f32.mrb[30].mxu0 }
 0xf85   :  { %v4389_v13 = vpop.f32.mrb[31].mxu0  ;;  %v3169_v14 = vsel %vm205_vm2, %v3168_v11, -inf  ;;  %v3339_v15 = vmul.f32 0.35355338, %v3335_v12 }
 0xf86   :  { %3170 = vmax.xlane.f32.xlu0 %v3169_v14 }
 0xf87   :  { %v3340_v16 = vadd.f32 %v3339_v15, %v4895_v23 }
 0xf89   :  { %v3341_v17 = vsel %vm205_vm2, %v3340_v16, -inf }
 0xf93   :  { %2157 = vrot.lane.b32.xlu1 %v5110_v25, %s5437_s19 }
 0xfb7   :  { %3342 = vmax.xlane.f32.xlu1 %v3341_v17 }
 0xfc8   :  { %2497 = vrot.lane.b32.xlu1 %v5110_v25, %s5438_s4 }
 0xfcc   :  { %2669 = vrot.lane.b32.xlu1 %v5110_v25, %s5439_s21 }
 0xfd0   :  { %2840 = vrot.lane.b32.xlu1 %v5124_v26, %s5437_s19 }
 0xffb   :  { %v2148_v18 = vpop.xlane.xlu0 %2147 }
 0xffc   :  { %v2149_v21 = vsub.f32 %v2145_v48, %v2148_v18  ;;  %v2316_v22 = vpop.xlane.xlu1 %2315 }
 0xffd   :  { %v2317_v24 = vsub.f32 %v2313_v49, %v2316_v22 }
 0xffe   :  { %v2150_v27 = vmul.f32 1.442695, %v2149_v21 }
 0xfff   :  { %v2318_v28 = vmul.f32 1.442695, %v2317_v24 }
0x1000   :  { %4599 = vpow2.f32 %v2150_v27 }
0x1001   :  { %4601 = vpow2.f32 %v2318_v28 }
0x1003   :  { %v2488_v23 = vpop.xlane.xlu0 %2487 }
0x1004   :  { %v2489_v44 = vsub.f32 %v5186_v56, %v2488_v23 }
0x1006   :  { %v2490_v41 = vmul.f32 1.442695, %v2489_v44  ;;  %v4007_v44 = vld [vmem:[%s5398_s6 + $0x20] sm:$0xff] }
0x1007   :  { %v2660_v29 = vpop.xlane.xlu0 %2659 }
0x1008   :  { %v2661_v30 = vsub.f32 %v2657_v61, %v2660_v29 }
0x100a   :  { %v4600_v31 = vpop.eup %4599  ;;  %v2662_v32 = vmul.f32 1.442695, %v2661_v30 }
0x100b   :  { %v5208_v34 = vpop.eup %4601  ;;  %v2152_v37 = vsel %vm205_vm2, %v4600_v31, 0.0  ;;  %v2831_v45 = vpop.xlane.xlu0 %2830 }
0x100c   :  { %4603 = vpow2.f32 %v2662_v32  ;;  %2153 = vadd.xlane.f32.xlu0 %v2152_v37  ;;  %v2320_v38 = vsel %vm205_vm2, %v5208_v34, 0.0  ;;  %v2832_v46 = vsub.f32 %v2828_v2, %v2831_v45  ;;  %v4008_v45 = vld [vmem:[%s5398_s6 + $0x28] sm:$0xff] }
0x100d   :  { %2321 = vadd.xlane.f32.xlu1 %v2320_v38  ;;  %4605 = vpow2.f32 %v2490_v41  ;;  %v4495_v41 = vpack.c.bf16 %v4008_v45, %v4007_v44  ;;  %v4028_v44 = vld [vmem:[%s5403_s12 + $0x48] sm:$0xff] }
0x100e   :  { %v2833_v35 = vmul.f32 1.442695, %v2832_v46 }
0x100f   :  { %v2999_v39 = vpop.xlane.xlu1 %2998  ;;  %4496 = vmatprep.subr.bf16.mxu0 %v4495_v41 }
0x1010   :  { %4607 = vpow2.f32 %v2833_v35  ;;  %v3000_v48 = vsub.f32 %v2996_v7, %v2999_v39  ;;  %v4010_v35 = vld [vmem:[%s5398_s6 + $0x38] sm:$0xff]  ;;  %4498 = vmatpush3.bf16.msra.mxu0 %v4495_v41  ;;  %v4029_v41 = vld [vmem:[%s5403_s12 + $0x50] sm:$0xff] }
0x1012   :  { %v3001_v50 = vmul.f32 1.442695, %v3000_v48 }
0x1013   :  { %v2158_v42 = vpop.permute.xlu1 %2157  ;;  %v3171_v47 = vpop.xlane.xlu0 %3170 }
0x1014   :  { %4321 = vmatpush3.msra.mxu1 %v2158_v42  ;;  %v3172_v33 = vsub.f32 %v3168_v11, %v3171_v47  ;;  %v4009_v47 = vld [vmem:[%s5398_s6 + $0x30] sm:$0xff] }
0x1015   :  { %4330 = vmatprep.subr.mxu1 %v4643_v36  ;;  %v4499_v48 = vpack.c.bf16 %v4010_v35, %v4009_v47  ;;  %v4031_v35 = vld [vmem:[%s5403_s12 + $0x60] sm:$0xff] }
0x1016   :  { %v5214_v40 = vpop.eup %4603  ;;  %v3173_v49 = vmul.f32 1.442695, %v3172_v33 }
0x1017   :  { %v2664_v43 = vsel %vm205_vm2, %v5214_v40, 0.0  ;;  %v4606_v52 = vpop.eup %4605  ;;  %4500 = vmatprep.subr.bf16.mxu0 %v4499_v48 }
0x1018   :  { %2665 = vadd.xlane.f32.xlu1 %v2664_v43  ;;  %4609 = vpow2.f32 %v3173_v49  ;;  %4502 = vmatpush3.bf16.msra.mxu0 %v4499_v48 }
0x1019   :  { %4611 = vpow2.f32 %v3001_v50 }
0x101a   :  { %v4608_v53 = vpop.eup %4607 }
0x101b   :  { %v2835_v55 = vsel %vm205_vm2, %v4608_v53, 0.0 }
0x1022   :  { %2325 = vrot.lane.b32.xlu0 %v5110_v25, %s5440_s2  ;;  %v2492_v25 = vsel %vm205_vm2, %v4606_v52, 0.0  ;;  %v5225_v56 = vpop.eup %4609 }
0x1023   :  { %v3175_v59 = vsel %vm205_vm2, %v5225_v56, 0.0  ;;  %v4612_v60 = vpop.eup %4611 }
0x1024   :  { %v3003_v61 = vsel %vm205_vm2, %v4612_v60, 0.0 }
0x1029   :  { %3008 = vrot.lane.b32.xlu1 %v5124_v26, %s5440_s2 }
0x1041   :  { %2493 = vadd.xlane.f32.xlu0 %v2492_v25 }
0x1044   :  { %v3343_v54 = vpop.xlane.xlu1 %3342 }
0x1045   :  { %v3344_v57 = vsub.f32 %v3340_v16, %v3343_v54  ;;  %2836 = vadd.xlane.f32.xlu0 %v2835_v55 }
0x1047   :  { %v3345_v58 = vmul.f32 1.442695, %v3344_v57 }
0x1048   :  { %v2498_v0 = vpop.permute.xlu1 %2497 }
0x1049   :  { %4613 = vpow2.f32 %v3345_v58  ;;  %3176 = vadd.xlane.f32.xlu0 %v3175_v59 }
0x104c   :  { %v2670_v1 = vpop.permute.xlu1 %2669 }
0x104d   :  { %3004 = vadd.xlane.f32.xlu1 %v3003_v61 }
0x1050   :  { %v2841_v2 = vpop.permute.xlu1 %2840 }
0x1053   :  { %v5230_v62 = vpop.eup %4613 }
0x1054   :  { %v3347_v63 = vsel %vm205_vm2, %v5230_v62, 0.0 }
0x1055   :  { %3348 = vadd.xlane.f32.xlu0 %v3347_v63  ;;  %v4012_v63 = vld [vmem:[%s5399_s7 + $0x1] ss:$0 sm:$0xff] }
0x105e   :  { %3352 = vrot.lane.b32.xlu1 %v5124_v26, %s5439_s21 }
0x106b   :  { %3180 = vrot.lane.b32.xlu0 %v5124_v26, %s5438_s4 }
0x1099   :  { %v2154_v3 = vpop.xlane.xlu0 %2153 }
0x109a   :  { %4615 = vrcp.f32 %v2154_v3  ;;  %v2322_v4 = vpop.xlane.xlu1 %2321 }
0x109b   :  { %4617 = vrcp.f32 %v2322_v4 }
0x109d   :  { %v2326_v8 = vpop.permute.xlu0 %2325 }
0x10a4   :  { %v4616_v5 = vpop.eup %4615 }
0x10a5   :  { %v2156_v6 = vmul.f32 %v4616_v5, %v4600_v31  ;;  %v4618_v7 = vpop.eup %4617  ;;  %v2666_v26 = vpop.xlane.xlu1 %2665 }
0x10a6   :  { %v2324_v9 = vmul.f32 %v4618_v7, %v5208_v34 }
0x10a7   :  { %4323 = vmatmul.mubr.msk.f32.vlgmr.msra.gmra.mrb[26].mxu1 %vm205_vm2, %v2156_v6 }
0x10a8   :  { %4331 = vmatpush3.msra.mxu1 %v2326_v8  ;;  %4332 = vmatprep.mubr.msk.f32.mxu1 %vm4644_vm1, %v4643_v36 }
0x10a9   :  { %4340 = vmatprep.subr.mxu1 %v4643_v36  ;;  %v3009_v11 = vpop.permute.xlu1 %3008 }
0x10ab   :  { %4333 = vmatmul.mubr.msk.f32.vlgmr.msra.gmra.mrb[28].mxu1 %vm205_vm2, %v2324_v9 }
0x10ac   :  { %4341 = vmatpush3.msra.mxu1 %v2498_v0  ;;  %4342 = vmatprep.mubr.msk.f32.mxu1 %vm4644_vm1, %v4643_v36 }
0x10ad   :  { %4350 = vmatprep.subr.mxu1 %v4643_v36 }
0x10ce   :  { %v2494_v10 = vpop.xlane.xlu0 %2493 }
0x10cf   :  { %4619 = vrcp.f32 %v2494_v10 }
0x10d0   :  { %4621 = vrcp.f32 %v2666_v26 }
0x10d2   :  { %v2837_v51 = vpop.xlane.xlu0 %2836 }
0x10d3   :  { %4623 = vrcp.f32 %v2837_v51 }
0x10d6   :  { %v3177_v14 = vpop.xlane.xlu0 %3176 }
0x10d9   :  { %v4620_v12 = vpop.eup %4619 }
0x10da   :  { %v2496_v13 = vmul.f32 %v4620_v12, %v4606_v52  ;;  %v3005_v15 = vpop.xlane.xlu1 %3004  ;;  %v4622_v16 = vpop.eup %4621 }
0x10db   :  { %4625 = vrcp.f32 %v3005_v15  ;;  %v2668_v17 = vmul.f32 %v4622_v16, %v5214_v40  ;;  %v4020_v15 = vld [vmem:[%s5400_s10 + $0x28] sm:$0xff] }
0x10dc   :  { %4343 = vmatmul.mubr.msk.f32.vlgmr.msra.gmra.mrb[30].mxu1 %vm205_vm2, %v2496_v13  ;;  %4627 = vrcp.f32 %v3177_v14 }
0x10dd   :  { %4351 = vmatpush3.msra.mxu1 %v2670_v1  ;;  %4352 = vmatprep.mubr.msk.f32.mxu1 %vm4644_vm1, %v4643_v36  ;;  %v4624_v18 = vpop.eup %4623 }
0x10de   :  { %4360 = vmatprep.subr.mxu1 %v4643_v36  ;;  %v2839_v21 = vmul.f32 %v4624_v18, %v4608_v53  ;;  %v3353_v30 = vpop.permute.xlu1 %3352  ;;  %v4022_v18 = vld [vmem:[%s5400_s10 + $0x38] sm:$0xff] }
0x10e0   :  { %4353 = vmatmul.mubr.msk.f32.vlgmr.msra.gmra.mrb[32].mxu1 %vm205_vm2, %v2668_v17  ;;  %v4021_v17 = vld [vmem:[%s5400_s10 + $0x30] sm:$0xff] }
0x10e1   :  { %4361 = vmatpush3.msra.mxu1 %v2841_v2  ;;  %4362 = vmatprep.mubr.msk.f32.mxu1 %vm4644_vm1, %v4643_v36 }
0x10e2   :  { %v3349_v22 = vpop.xlane.xlu0 %3348  ;;  %4370 = vmatprep.subr.mxu1 %v4643_v36 }
0x10e3   :  { %4629 = vrcp.f32 %v3349_v22 }
0x10e4   :  { %4363 = vmatmul.mubr.msk.f32.vlgmr.msra.gmra.mrb[34].mxu1 %vm205_vm2, %v2839_v21  ;;  %v4507_v21 = vpack.c.bf16 %v4022_v18, %v4021_v17 }
0x10e5   :  { %v4626_v24 = vpop.eup %4625  ;;  %4371 = vmatpush3.msra.mxu1 %v3009_v11  ;;  %4372 = vmatprep.mubr.msk.f32.mxu1 %vm4644_vm1, %v4643_v36 }
0x10e6   :  { %v3007_v27 = vmul.f32 %v4626_v24, %v4612_v60  ;;  %v3181_v28 = vpop.permute.xlu0 %3180  ;;  %4380 = vmatprep.subr.mxu1 %v4643_v36  ;;  %v4628_v23 = vpop.eup %4627 }
0x10e7   :  { %v3179_v29 = vmul.f32 %v4628_v23, %v5225_v56 }
0x10e8   :  { %4373 = vmatmul.mubr.msk.f32.vlgmr.msra.gmra.mrb[36].mxu1 %vm205_vm2, %v3007_v27 }
0x10e9   :  { %4381 = vmatpush3.msra.mxu1 %v3181_v28  ;;  %4382 = vmatprep.mubr.msk.f32.mxu1 %vm4644_vm1, %v4643_v36 }
0x10ea   :  { %4390 = vmatprep.subr.mxu1 %v4643_v36 }
0x10ec   :  { %4383 = vmatmul.mubr.msk.f32.vlgmr.msra.gmra.mrb[38].mxu1 %vm205_vm2, %v3179_v29 }
0x10ed   :  { %v4630_v31 = vpop.eup %4629  ;;  %4391 = vmatpush3.msra.mxu1 %v3353_v30  ;;  %4392 = vmatprep.mubr.msk.f32.mxu1 %vm4644_vm1, %v4643_v36 }
0x10ee   :  { %v3351_v32 = vmul.f32 %v4630_v31, %v5230_v62  ;;  %v4017_v31 = vld [vmem:[%s5401_s8 + $0x1] ss:$0 sm:$0xff] }
0x10f0   :  { %4393 = vmatmul.mubr.msk.f32.vlgmr.msra.gmra.mrb[40].mxu1 %vm205_vm2, %v3351_v32 }
0x117a   :  { %v2229_v34 = vpop.f32.mrb[26].mxu1 }
0x117b   :  { %2233 = vst.msk [vmem:[#allocation2] sm:$0xff] %vm205_vm2, %v2229_v34  ;;  %v4324_v37 = vpop.f32.mrb[27].mxu1  ;;  %v4018_v34 = vld [vmem:[%s5402_s9 + $0x1] ss:$0 sm:$0xff] }
0x117e   :  { %v2397_v38 = vpop.f32.mrb[28].mxu1 }
0x117f   :  { %2402 = vrot.lane.b32.xlu0 %v2397_v38, %s4656_s30  ;;  %v4334_v39 = vpop.f32.mrb[29].mxu1 }
0x11af   :  { %v2569_v42 = vpop.f32.mrb[30].mxu1 }
0x11b0   :  { %2574 = vrot.lane.b32.xlu1 %v2569_v42, %s5441_s23  ;;  %v4344_v40 = vpop.f32.mrb[31].mxu1 }
0x11b3   :  { %v2741_v43 = vpop.f32.mrb[32].mxu1 }
0x11b4   :  { %2746 = vrot.lane.b32.xlu1 %v2741_v43, %s5442_s27  ;;  %v4354_v36 = vpop.f32.mrb[33].mxu1 }
0x11b5   :  { %v4027_v36 = vld [vmem:[%s5403_s12 + $0x40] sm:$0xff] }
0x11b6   :  { %v4511_v45 = vpack.c.bf16 %v4028_v44, %v4027_v36 }
0x11b7   :  { %v2912_v46 = vpop.f32.mrb[34].mxu1 }
0x11b8   :  { %2916 = vst.msk [vmem:[#allocation2 + $0x8] sm:$0xff] %vm205_vm2, %v2912_v46  ;;  %v4364_v33 = vpop.f32.mrb[35].mxu1  ;;  %v4030_v46 = vld [vmem:[%s5403_s12 + $0x58] sm:$0xff]  ;;  %4512 = vmatprep.subr.bf16.mxu0 %v4511_v45 }
0x11b9   :  { %v4515_v47 = vpack.c.bf16 %v4030_v46, %v4029_v41  ;;  %v4032_v33 = vld [vmem:[%s5403_s12 + $0x68] sm:$0xff]  ;;  %v4041_v41 = vld [vmem:[%s5406_s14 + $0x1] ss:$0 sm:$0xff] }
0x11ba   :  { %v4519_v48 = vpack.c.bf16 %v4032_v33, %v4031_v35  ;;  %v4042_v33 = vld [vmem:[%s5407_s15 + $0x1] ss:$0 sm:$0xff] }
0x11bb   :  { %v3080_v49 = vpop.f32.mrb[36].mxu1 }
0x11bc   :  { %3085 = vrot.lane.b32.xlu0 %v3080_v49, %s4656_s30  ;;  %v4374_v50 = vpop.f32.mrb[37].mxu1  ;;  %v4033_v49 = vld [vmem:[%s5403_s12 + $0x70] sm:$0xff] }
0x11bd   :  { %v4034_v50 = vld [vmem:[%s5403_s12 + $0x78] sm:$0xff] }
0x11bf   :  { %v3252_v52 = vpop.f32.mrb[38].mxu1 }
0x11c0   :  { %3257 = vrot.lane.b32.xlu0 %v3252_v52, %s5441_s23  ;;  %v4384_v25 = vpop.f32.mrb[39].mxu1  ;;  %v4523_v52 = vpack.c.bf16 %v4034_v50, %v4033_v49 }
0x11c1   :  { %v4024_v25 = vld [vmem:[%s5404_s11 + $0x1] ss:$0 sm:$0xff] }
0x11c3   :  { %v3424_v53 = vpop.f32.mrb[40].mxu1 }
0x11c4   :  { %3429 = vrot.lane.b32.xlu1 %v3424_v53, %s5442_s27  ;;  %v4394_v54 = vpop.f32.mrb[41].mxu1 }
0x11f1   :  { %v2403_v55 = vpop.permute.xlu0 %2402 }
0x11f2   :  { %2405 = vst.msk [vmem:[#allocation2] sm:$0xff] %vm545_vm3, %v2403_v55 }
0x1222   :  { %v2575_v56 = vpop.permute.xlu1 %2574 }
0x1223   :  { %2577 = vst.msk [vmem:[#allocation2] sm:$0xff] %vm718_vm4, %v2575_v56 }
0x1226   :  { %v2747_v57 = vpop.permute.xlu1 %2746 }
0x1227   :  { %2749 = vst.msk [vmem:[#allocation2] sm:$0xff] %vm891_vm5, %v2747_v57 }
0x122e   :  { %v3086_v58 = vpop.permute.xlu0 %3085  ;;  %v3433_v59 = vld [vmem:[#allocation2] sm:$0xff] }
0x122f   :  { %3088 = vst.msk [vmem:[#allocation2 + $0x8] sm:$0xff] %vm545_vm3, %v3086_v58  ;;  %4403 = vmatprep.mubr.msk.f32.mxu0 %vm66_vm0, %v3433_v59 }
0x1232   :  { %v3258_v60 = vpop.permute.xlu0 %3257 }
0x1233   :  { %3260 = vst.msk [vmem:[#allocation2 + $0x8] sm:$0xff] %vm718_vm4, %v3258_v60 }
0x1236   :  { %v3430_v61 = vpop.permute.xlu1 %3429 }
0x1237   :  { %3432 = vst.msk [vmem:[#allocation2 + $0x8] sm:$0xff] %vm891_vm5, %v3430_v61 }
0x123e   :  { %v3434_v62 = vld [vmem:[#allocation2 + $0x8] sm:$0xff] }
0x123f   :  { %4404 = vmatmul.mubr.msk.f32.vlgmr.msra.gmra.mrb[32].mxu0 %vm66_vm0, %v3434_v62 }
0x1240   :  { %4514 = vmatpush3.bf16.msra.mxu0 %v4511_v45 }
0x1241   :  { %4516 = vmatprep.subr.bf16.mxu0 %v4515_v47 }
0x1244   :  { %4518 = vmatpush3.bf16.msra.mxu0 %v4515_v47 }
0x1245   :  { %4520 = vmatprep.subr.bf16.mxu0 %v4519_v48 }
0x1248   :  { %4522 = vmatpush3.bf16.msra.mxu0 %v4519_v48 }
0x1249   :  { %4524 = vmatprep.subr.bf16.mxu0 %v4523_v52 }
0x124c   :  { %4526 = vmatpush3.bf16.msra.mxu0 %v4523_v52 }
0x1312   :  { %v4405_v0 = vpop.f32.mrb[32].mxu0 }
0x1313   :  { %v3526_v1 = vadd.f32 %v4405_v0, %v4012_v63  ;;  %v3520_v2 = vpop.f32.mrb[33].mxu0 }
0x1314   :  { %v3521_v3 = vadd.f32 %v4012_v63, %v3520_v2 }
0x1315   :  { %v3530_v4 = vadd.f32 %v3526_v1, %v5099_v20 }
0x1316   :  { %v3529_v5 = vadd.f32 %v3521_v3, %v5097_v19  ;;  %v4019_v19 = vld [vmem:[%s5400_s10 + $0x20] sm:$0xff] }
0x1317   :  { %v3538_v6 = vsel %vm66_vm0, %v3530_v4, 0.0  ;;  %v4503_v16 = vpack.c.bf16 %v4020_v15, %v4019_v19 }
0x1318   :  { %3539 = vadd.xlane.f32.xlu1 %v3538_v6  ;;  %v3535_v7 = vsel %vm66_vm0, %v3529_v5, 0.0 }
0x1319   :  { %3536 = vadd.xlane.f32.xlu0 %v3535_v7  ;;  %4504 = vmatprep.subr.bf16.mxu1 %v4503_v16 }
0x131a   :  { %4506 = vmatpush3.bf16.msra.mxu1 %v4503_v16 }
0x131b   :  { %4508 = vmatprep.subr.bf16.mxu1 %v4507_v21 }
0x131e   :  { %4510 = vmatpush3.bf16.msra.mxu1 %v4507_v21 }
0x13a5   :  { %v3540_v8 = vpop.xlane.xlu1 %3539 }
0x13a6   :  { %v3542_v9 = vmul.f32 0.03125, %v3540_v8  ;;  %v3537_v26 = vpop.xlane.xlu0 %3536 }
0x13a7   :  { %v3541_v10 = vmul.f32 0.03125, %v3537_v26 }
0x13a8   :  { %v3544_v51 = vsub.f32 %v3530_v4, %v3542_v9 }
0x13a9   :  { %v3543_v11 = vsub.f32 %v3529_v5, %v3541_v10  ;;  %v4036_v10 = vld [vmem:[%s5405_s13 + $0x1] ss:$0 sm:$0xff] }
0x13aa   :  { %v3546_v14 = vmul.f32 %v3544_v51, %v3544_v51 }
0x13ab   :  { %v3545_v12 = vmul.f32 %v3543_v11, %v3543_v11 }
0x13ac   :  { %v3550_v20 = vsel %vm66_vm0, %v3546_v14, 0.0 }
0x13ad   :  { %v3547_v13 = vsel %vm66_vm0, %v3545_v12, 0.0 }
0x13ae   :  { %3548 = vadd.xlane.f32.xlu0 %v3547_v13 }
0x13b2   :  { %3551 = vadd.xlane.f32.xlu0 %v3550_v20 }
0x143b   :  { %v3549_v22 = vpop.xlane.xlu0 %3548 }
0x143c   :  { %v3553_v24 = vmul.f32 0.03125, %v3549_v22 }
0x143e   :  { %v3555_v27 = vadd.f32 1e-12, %v3553_v24 }
0x143f   :  { %v3552_v28 = vpop.xlane.xlu0 %3551 }
0x1440   :  { %4631 = vrsqrt.f32 %v3555_v27  ;;  %v3554_v23 = vmul.f32 0.03125, %v3552_v28 }
0x1442   :  { %v3556_v29 = vadd.f32 1e-12, %v3554_v23 }
0x1444   :  { %4633 = vrsqrt.f32 %v3556_v29 }
0x144a   :  { %v4632_v30 = vpop.eup %4631 }
0x144b   :  { %v3559_v32 = vmul.f32 %v4632_v30, %v3543_v11  ;;  %v3835_v30 = vld [vmem:[%s5408_s16] sm:$0xff] }
0x144d   :  { %v3567_v37 = vmul.f32 %v4017_v31, %v3559_v32 }
0x144e   :  { %v4634_v38 = vpop.eup %4633 }
0x144f   :  { %v3560_v39 = vmul.f32 %v4634_v38, %v3544_v51  ;;  %v3575_v42 = vadd.f32 %v4018_v34, %v3567_v37  ;;  %v3838_v37 = vld [vmem:[%s5408_s16 + $0x18] sm:$0xff] }
0x1451   :  { %v3568_v40 = vmul.f32 %v4017_v31, %v3560_v39  ;;  %4414 = vmatprep.mubr.msk.f32.mxu1 %vm66_vm0, %v3575_v42  ;;  %v3836_v31 = vld [vmem:[%s5408_s16 + $0x8] sm:$0xff] }
0x1452   :  { %v4527_v32 = vpack.c.bf16 %v3836_v31, %v3835_v30 }
0x1453   :  { %v3576_v43 = vadd.f32 %v4018_v34, %v3568_v40  ;;  %v3837_v34 = vld [vmem:[%s5408_s16 + $0x10] sm:$0xff] }
0x1454   :  { %4528 = vmatprep.subr.bf16.mxu1 %v4527_v32  ;;  %v4531_v38 = vpack.c.bf16 %v3838_v37, %v3837_v34 }
0x1455   :  { %4415 = vmatmul.mubr.msk.f32.vlgmr.msra.gmra.mrb[42].mxu1 %vm66_vm0, %v3576_v43 }
0x1456   :  { %4530 = vmatpush3.bf16.msra.mxu1 %v4527_v32 }
0x1457   :  { %4532 = vmatprep.subr.bf16.mxu1 %v4531_v38 }
0x145a   :  { %4534 = vmatpush3.bf16.msra.mxu1 %v4531_v38 }
0x1528   :  { %v4416_v53 = vpop.f32.mrb[42].mxu1 }
0x1529   :  { %v3668_v54 = vadd.f32 %v4416_v53, %v4024_v25  ;;  %v3662_v55 = vpop.f32.mrb[43].mxu1 }
0x152a   :  { %v3663_v56 = vadd.f32 %v4024_v25, %v3662_v55  ;;  %v4043_v25 = vld [vmem:[%s5409_s17] ss:$0 sm:$0xff] }
0x152b   :  { %v3674_v57 = vmul.f32 0.044715, %v3668_v54  ;;  %v3672_v8 = vmul.f32 0.5, %v3668_v54 }
0x152c   :  { %v3673_v58 = vmul.f32 0.044715, %v3663_v56  ;;  %v3671_v6 = vmul.f32 0.5, %v3663_v56 }
0x152d   :  { %v3676_v59 = vmul.f32 %v3674_v57, %v3668_v54 }
0x152e   :  { %v3675_v60 = vmul.f32 %v3673_v58, %v3663_v56 }
0x152f   :  { %v3678_v61 = vmul.f32 %v3676_v59, %v3668_v54 }
0x1530   :  { %v3677_v62 = vmul.f32 %v3675_v60, %v3663_v56 }
0x1531   :  { %v3680_v63 = vadd.f32 %v3678_v61, %v3668_v54 }
0x1532   :  { %v3679_v0 = vadd.f32 %v3677_v62, %v3663_v56 }
0x1533   :  { %v3682_v1 = vmul.f32 0.7978846, %v3680_v63 }
0x1534   :  { %v3681_v2 = vmul.f32 0.7978846, %v3679_v0 }
0x1535   :  { %4635 = vtanh.f32 %v3682_v1 }
0x1536   :  { %4637 = vtanh.f32 %v3681_v2 }
0x153f   :  { %v4636_v3 = vpop.eup %4635 }
0x1540   :  { %v4638_v4 = vpop.eup %4637  ;;  %v3686_v5 = vadd.f32 1.0, %v4636_v3 }
0x1541   :  { %v3685_v7 = vadd.f32 1.0, %v4638_v4 }
0x1542   :  { %v3688_v26 = vmul.f32 %v3686_v5, %v3672_v8 }
0x1543   :  { %v3687_v9 = vmul.f32 %v3685_v7, %v3671_v6 }
0x1545   :  { %4433 = vmatprep.mubr.msk.f32.mxu0 %vm1845_vm6, %v3687_v9 }
0x1546   :  { %4434 = vmatmul.mubr.msk.f32.vlgmr.msra.gmra.mrb[34].mxu0 %vm1845_vm6, %v3688_v26 }
0x1619   :  { %v4435_v51 = vpop.f32.mrb[34].mxu0 }
0x161a   :  { %v3784_v11 = vadd.f32 %v4435_v51, %v4036_v10  ;;  %v3778_v12 = vpop.f32.mrb[35].mxu0 }
0x161b   :  { %v3779_v13 = vadd.f32 %v4036_v10, %v3778_v12 }
0x161c   :  { %v3788_v14 = vadd.f32 %v3784_v11, %v3576_v43 }
0x161d   :  { %v3787_v20 = vadd.f32 %v3779_v13, %v3575_v42 }
0x161e   :  { %v3796_v19 = vsel %vm66_vm0, %v3788_v14, 0.0 }
0x161f   :  { %3797 = vadd.xlane.f32.xlu1 %v3796_v19  ;;  %v3793_v15 = vsel %vm66_vm0, %v3787_v20, 0.0 }
0x1620   :  { %3794 = vadd.xlane.f32.xlu0 %v3793_v15 }
0x16ac   :  { %v3798_v16 = vpop.xlane.xlu1 %3797 }
0x16ad   :  { %v3800_v17 = vmul.f32 0.03125, %v3798_v16  ;;  %v3795_v18 = vpop.xlane.xlu0 %3794 }
0x16ae   :  { %v3799_v21 = vmul.f32 0.03125, %v3795_v18 }
0x16af   :  { %v3802_v22 = vsub.f32 %v3788_v14, %v3800_v17 }
0x16b0   :  { %v3801_v24 = vsub.f32 %v3787_v20, %v3799_v21 }
0x16b1   :  { %v3804_v27 = vmul.f32 %v3802_v22, %v3802_v22 }
0x16b2   :  { %v3803_v28 = vmul.f32 %v3801_v24, %v3801_v24 }
0x16b3   :  { %v3808_v23 = vsel %vm66_vm0, %v3804_v27, 0.0 }
0x16b4   :  { %3809 = vadd.xlane.f32.xlu1 %v3808_v23  ;;  %v3805_v29 = vsel %vm66_vm0, %v3803_v28, 0.0 }
0x16b5   :  { %3806 = vadd.xlane.f32.xlu0 %v3805_v29 }
0x1741   :  { %v3810_v39 = vpop.xlane.xlu1 %3809 }
0x1742   :  { %v3812_v42 = vmul.f32 0.03125, %v3810_v39  ;;  %v3807_v40 = vpop.xlane.xlu0 %3806 }
0x1743   :  { %v3811_v43 = vmul.f32 0.03125, %v3807_v40 }
0x1744   :  { %v3814_v36 = vadd.f32 1e-12, %v3812_v42 }
0x1745   :  { %v3813_v44 = vadd.f32 1e-12, %v3811_v43 }
0x1746   :  { %4639 = vrsqrt.f32 %v3814_v36 }
0x1747   :  { %4641 = vrsqrt.f32 %v3813_v44 }
0x1750   :  { %v4640_v45 = vpop.eup %4639 }
0x1751   :  { %v4642_v46 = vpop.eup %4641  ;;  %v3818_v47 = vmul.f32 %v4640_v45, %v3802_v22 }
0x1752   :  { %v3817_v35 = vmul.f32 %v4642_v46, %v3801_v24 }
0x1753   :  { %v3826_v48 = vmul.f32 %v4041_v41, %v3818_v47 }
0x1754   :  { %v3825_v49 = vmul.f32 %v4041_v41, %v3817_v35 }
0x1755   :  { %v3834_v52 = vadd.f32 %v4042_v33, %v3826_v48 }
0x1756   :  { %v3833_v50 = vadd.f32 %v4042_v33, %v3825_v49 }
0x1758   :  { %4444 = vmatprep.mubr.msk.f32.mxu1 %vm66_vm0, %v3833_v50 }
0x1759   :  { %4445 = vmatmul.mubr.msk.f32.vlgmr.msra.gmra.mrb[44].mxu1 %vm66_vm0, %v3834_v52 }
0x182c   :  { %v4446_v53 = vpop.f32.mrb[44].mxu1 }
0x182d   :  { %v3924_v54 = vadd.f32 %v4446_v53, %v4043_v25  ;;  %v3918_v55 = vpop.f32.mrb[45].mxu1 }
0x182e   :  { %v3919_v56 = vadd.f32 %v4043_v25, %v3918_v55 }
0x182f   :  { %3928 = vst [vmem:[%s5410_s18 + $0x8] sm:$0xff] %v3924_v54 }
0x1830   :  { %3927 = vst [vmem:[%s5410_s18] sm:$0xff] %v3919_v56 }

</bundles_post_ra>
